<compile_context>
chip_gen: v7x
topology: tpu7x:2x2x1
jax: 0.10.0
libtpu: 0.0.40
codegen_flags: <defaults>
</compile_context>

<pallas_src>
import jax
import jax.numpy as jnp
import numpy as np
from jax.experimental import pallas as pl
from jax.experimental.pallas import tpu as pltpu

_EPS = 1e-5


# ------------------------- in-kernel helpers ------------------------------- #

def _bmm(w2d, x_bcl):
    """Apply a (O, C) weight per sample: (bN, C, L) -> (bN, O, L), f32 acc."""
    bN = x_bcl.shape[0]
    wb = jnp.broadcast_to(w2d, (bN,) + w2d.shape)
    return jnp.einsum('boc,bcl->bol', wb, x_bcl,
                      preferred_element_type=jnp.float32)


def _channel_stats(o):
    """Per-channel (sum, sum_sq) of o:(bN, C, L) f32 -> (2, C), on the MXU.

    sum    = o @ ones           (per sample, tiny batch-sum after)
    sum_sq = diag(o @ o^T)      (batched Gram; avoids a full-tile VALU o*o)
    """
    bN, C, L = o.shape
    ones_l = jnp.ones((L, 1), dtype=jnp.float32)
    s = jnp.einsum('bcl,lk->bck', o, ones_l,
                   preferred_element_type=jnp.float32)[..., 0]          # (bN, C)
    s = jnp.sum(s, axis=0, keepdims=True)                               # (1, C)
    g = jnp.einsum('bcl,bdl->bcd', o, o,
                   preferred_element_type=jnp.float32)                  # (bN, C, C)
    eye = jnp.eye(C, dtype=jnp.float32)
    q = jnp.sum(jnp.sum(g * eye[None], axis=2), axis=0, keepdims=True)  # (1, C)
    return jnp.concatenate([s, q], axis=0)                              # (2, C)


# ------------------------------ kernels ------------------------------------ #

def _conv1x1_stats_kernel(x_ref, w_ref, h_ref, stat_ref):
    """h1 = W1 @ x (per sample); emit per-tile per-channel (sum, sum_sq)."""
    x = x_ref[...].astype(w_ref.dtype)
    h = _bmm(w_ref[...], x)                                   # (bN, width, L) f32
    h_ref[...] = h.astype(h_ref.dtype)
    stat_ref[...] = _channel_stats(h)[None]


def _bn_relu_conv3_stats_kernel(h_ref, scale_ref, bias_ref, w_ref,
                                o_ref, stat_ref):
    """a = relu(h1*s+b); h2 = 3-tap conv of a (zero pad per sample); stats."""
    cdt = w_ref.dtype
    L = h_ref.shape[2]
    a = jnp.maximum(h_ref[...].astype(jnp.float32) * scale_ref[...]
                    + bias_ref[...], 0.0)                               # (bN, C, L)
    # Lane rolls (XLU slot) + boundary masks give the zero-padded neighbours;
    # whole samples per tile -> no cross-tile halo needed.
    pos = jax.lax.broadcasted_iota(jnp.int32, (1, 1, L), 2)
    left = jnp.where(pos == 0, 0.0, pltpu.roll(a, shift=1, axis=2))          # a[l-1]
    right = jnp.where(pos == L - 1, 0.0, pltpu.roll(a, shift=L - 1, axis=2))  # a[l+1]
    # Three accumulating MXU matmuls; no (3*width, L) concat materialised.
    o = (_bmm(w_ref[0], left.astype(cdt))
         + _bmm(w_ref[1], a.astype(cdt))
         + _bmm(w_ref[2], right.astype(cdt)))
    o_ref[...] = o.astype(o_ref.dtype)
    stat_ref[...] = _channel_stats(o)[None]


def _a2_stats_kernel(h_ref, scale_ref, bias_ref, sum_ref, gram_ref):
    """a2 = relu(h2*s+b); emit sum(a2) and Gram(a2) so BN3 stats are analytic."""
    a = jnp.maximum(h_ref[...].astype(jnp.float32) * scale_ref[...]
                    + bias_ref[...], 0.0)                               # (bN, C, L)
    bN, C, L = a.shape
    ones_l = jnp.ones((L, 1), dtype=jnp.float32)
    s = jnp.einsum('bcl,lk->bck', a, ones_l,
                   preferred_element_type=jnp.float32)[..., 0]          # (bN, C)
    sum_ref[...] = jnp.sum(s, axis=0, keepdims=True)[None]              # (1, 1, C)
    g = jnp.einsum('bcl,bdl->bcd', a, a,
                   preferred_element_type=jnp.float32)                  # (bN, C, C)
    gram_ref[...] = jnp.sum(g, axis=0)[None]                            # (1, C, C)


def _conv1x1_bn_residual_relu_kernel(h_ref, x_ref, scale2_ref, bias2_ref,
                                     w_ref, scale3_ref, bias3_ref, o_ref):
    """Fused: a2 = relu(bn2(h2)); h3 = W3 @ a2; out = relu(bn3(h3) + x)."""
    a = jnp.maximum(h_ref[...].astype(jnp.float32) * scale2_ref[...]
                    + bias2_ref[...], 0.0)
    h3 = _bmm(w_ref[...], a.astype(w_ref.dtype))                        # (bN, Cout, L)
    o_ref[...] = jnp.maximum(
        h3 * scale3_ref[...] + bias3_ref[...] + x_ref[...].astype(jnp.float32),
        0.0).astype(o_ref.dtype)


# ------------------------------ wrapper ------------------------------------ #

def _samples_per_tile(N, L, target_cols):
    """Whole samples per tile (no conv halo). Prefers the largest tile within
    the lane budget that still leaves >= 2 tiles (v7x megacore / pipelining)."""
    divisors = [d for d in range(1, N + 1) if N % d == 0]
    cand = [d for d in divisors if d * L <= target_cols and N // d >= 2]
    if cand:
        return max(cand)
    return 1 if N >= 2 else N


def _finalize_bn(stats, gamma, beta, count, eps=_EPS):
    """Fold per-tile packed (sum, sum_sq) into per-channel scale/bias, f32."""
    s = jnp.sum(stats, axis=0)                     # (2, C)
    mean = s[0] / count
    var = jnp.maximum(s[1] / count - mean * mean, 0.0)
    scale = gamma * jax.lax.rsqrt(var + eps)
    bias = beta - mean * scale
    C = mean.shape[0]
    return (scale.reshape(1, C, 1).astype(jnp.float32),
            bias.reshape(1, C, 1).astype(jnp.float32))


def bottleneck_forward(x_ncl, w1, g1, b1, w2, g2, b2, w3, g3, b3,
                       *, use_bf16=True, target_tile_cols=8192):
    """x_ncl: (N, Cin, L) f32; w1:(width,Cin,1) w2:(width,width,3) w3:(Cout,width,1)."""
    N, Cin, L = x_ncl.shape
    width = w1.shape[0]
    Cout = w3.shape[0]
    assert Cin == Cout, "downsample=None requires inplanes == planes*expansion"
    assert w2.shape == (width, width, 3)

    cdt = jnp.bfloat16 if use_bf16 else jnp.float32   # MXU operand / slab dtype
    bN = _samples_per_tile(N, L, target_tile_cols)
    num_tiles = N // bN
    count = float(N * L)

    # Single cdt copy of x feeds both the first conv and the residual add.
    x_in = x_ncl.astype(cdt)
    w1_2d = w1[:, :, 0].astype(cdt)                       # (width, Cin)
    w2_t = jnp.transpose(w2, (2, 0, 1)).astype(cdt)       # (3, width, width) taps
    w3_2d = w3[:, :, 0].astype(cdt)                       # (Cout, width)

    def act_spec(C):
        return pl.BlockSpec((bN, C, L), lambda i: (i, 0, 0))

    def vec_spec(C):
        return pl.BlockSpec((1, C, 1), lambda i: (0, 0, 0))

    def wspec(shape):
        return pl.BlockSpec(shape, lambda i: (0,) * len(shape))

    def stat_spec(shape):
        return pl.BlockSpec((1,) + shape, lambda i: (i, 0, 0))

    par = pltpu.CompilerParams(dimension_semantics=("parallel",),
                               vmem_limit_bytes=48 * 1024 * 1024)

    # ---- stage 1: conv1x1 (Cin -> width) + BN1 partial stats -------------- #
    h1, st1 = pl.pallas_call(
        _conv1x1_stats_kernel,
        grid=(num_tiles,),
        in_specs=[act_spec(Cin), wspec((width, Cin))],
        out_shape=(jax.ShapeDtypeStruct((N, width, L), cdt),
                   jax.ShapeDtypeStruct((num_tiles, 2, width), jnp.float32)),
        out_specs=(act_spec(width), stat_spec((2, width))),
        compiler_params=par,
    )(x_in, w1_2d)
    scale1, bias1 = _finalize_bn(st1, g1, b1, count)

    # ---- stage 2: BN1 affine + ReLU + fused conv3x3 + BN2 partial stats --- #
    h2, st2 = pl.pallas_call(
        _bn_relu_conv3_stats_kernel,
        grid=(num_tiles,),
        in_specs=[act_spec(width), vec_spec(width), vec_spec(width),
                  wspec((3, width, width))],
        out_shape=(jax.ShapeDtypeStruct((N, width, L), cdt),
                   jax.ShapeDtypeStruct((num_tiles, 2, width), jnp.float32)),
        out_specs=(act_spec(width), stat_spec((2, width))),
        compiler_params=par,
    )(h1, scale1, bias1, w2_t)
    scale2, bias2 = _finalize_bn(st2, g2, b2, count)

    # ---- stage 3: a2 statistics (sum + Gram) for analytic BN3 ------------- #
    s_a2, gram_a2 = pl.pallas_call(
        _a2_stats_kernel,
        grid=(num_tiles,),
        in_specs=[act_spec(width), vec_spec(width), vec_spec(width)],
        out_shape=(jax.ShapeDtypeStruct((num_tiles, 1, width), jnp.float32),
                   jax.ShapeDtypeStruct((num_tiles, width, width), jnp.float32)),
        out_specs=(stat_spec((1, width)), stat_spec((width, width))),
        compiler_params=par,
    )(h2, scale2, bias2)

    # BN3 statistics follow linearly from a2:  h3 = W3 @ a2 (per position).
    w3f = w3_2d.astype(jnp.float32)
    S = jnp.sum(s_a2, axis=0)[0]                          # (width,)
    G = jnp.sum(gram_a2, axis=0)                          # (width, width)
    mean3 = (w3f @ S) / count                             # (Cout,)
    ex2_3 = jnp.einsum('ow,wv,ov->o', w3f, G, w3f) / count
    var3 = jnp.maximum(ex2_3 - mean3 * mean3, 0.0)
    scale3_v = g3 * jax.lax.rsqrt(var3 + _EPS)
    bias3_v = b3 - mean3 * scale3_v
    scale3 = scale3_v.reshape(1, Cout, 1).astype(jnp.float32)
    bias3 = bias3_v.reshape(1, Cout, 1).astype(jnp.float32)

    # ---- stage 4 (fused): conv1x1_b + BN3 affine + residual + ReLU -------- #
    # h3 never touches HBM.  Output kept f32 to match the module's dtype.
    out = pl.pallas_call(
        _conv1x1_bn_residual_relu_kernel,
        grid=(num_tiles,),
        in_specs=[act_spec(width), act_spec(Cin), vec_spec(width),
                  vec_spec(width), wspec((Cout, width)), vec_spec(Cout),
                  vec_spec(Cout)],
        out_shape=jax.ShapeDtypeStruct((N, Cout, L), jnp.float32),
        out_specs=act_spec(Cout),
        compiler_params=par,
    )(h2, x_in, scale2, bias2, w3_2d, scale3, bias3)

    return out                                            # (N, Cout, L)


# ----------------------------- reference ----------------------------------- #

def reference_forward(x, w1, g1, b1, w2, g2, b2, w3, g3, b3, eps=_EPS):
    """Pure-JAX mirror of the PyTorch Bottleneck (training-mode BatchNorm1d)."""
    def conv(h, w, pad):
        return jax.lax.conv_general_dilated(
            h, w, window_strides=(1,), padding=((pad, pad),),
            dimension_numbers=("NCH", "OIH", "NCH"))

    def bn(h, g, b):
        mean = jnp.mean(h, axis=(0, 2), keepdims=True)
        var = jnp.mean((h - mean) ** 2, axis=(0, 2), keepdims=True)
        return ((h - mean) * jax.lax.rsqrt(var + eps)
                * g.reshape(1, -1, 1) + b.reshape(1, -1, 1))

    h = jax.nn.relu(bn(conv(x, w1, 0), g1, b1))
    h = jax.nn.relu(bn(conv(h, w2, 1), g2, b2))
    h = bn(conv(h, w3, 0), g3, b3)
    return jax.nn.relu(h + x)


# -------------------------------- main -------------------------------------- #

if __name__ == "__main__":
    # Bottleneck(inplanes=32, planes=8): width=8, output channels = 4*8 = 32.
    N, planes, L = 4, 8, 256
    width = planes
    inplanes = planes * 4          # identity residual requires inplanes == 4*planes

    key = jax.random.PRNGKey(0)
    (kx, kw1, kw2, kw3, kg1, kb1, kg2, kb2, kg3, kb3) = jax.random.split(key, 10)

    x = jax.random.normal(kx, (N, inplanes, L), dtype=jnp.float32)
    w1 = jax.random.normal(kw1, (width, inplanes, 1), dtype=jnp.float32) * 0.2
    w2 = jax.random.normal(kw2, (width, width, 3), dtype=jnp.float32) * 0.2
    w3 = jax.random.normal(kw3, (inplanes, width, 1), dtype=jnp.float32) * 0.2
    g1 = 1.0 + 0.1 * jax.random.normal(kg1, (width,), dtype=jnp.float32)
    b1 = 0.1 * jax.random.normal(kb1, (width,), dtype=jnp.float32)
    g2 = 1.0 + 0.1 * jax.random.normal(kg2, (width,), dtype=jnp.float32)
    b2 = 0.1 * jax.random.normal(kb2, (width,), dtype=jnp.float32)
    g3 = 1.0 + 0.1 * jax.random.normal(kg3, (inplanes,), dtype=jnp.float32)
    b3 = 0.1 * jax.random.normal(kb3, (inplanes,), dtype=jnp.float32)

    fwd = jax.jit(bottleneck_forward,
                  static_argnames=("use_bf16", "target_tile_cols"))

    ref = jax.block_until_ready(
        reference_forward(x, w1, g1, b1, w2, g2, b2, w3, g3, b3))

    # f32 path (tight check of kernel logic); target_tile_cols=256 forces a
    # 4-tile grid to exercise the multi-tile partial-stats reduction.
    out_f32 = jax.block_until_ready(
        fwd(x, w1, g1, b1, w2, g2, b2, w3, g3, b3,
            use_bf16=False, target_tile_cols=256))
    np.testing.assert_allclose(np.asarray(out_f32), np.asarray(ref),
                               rtol=1e-3, atol=1e-3)

    # bf16-MXU / bf16-slab path (recommended on v6e/v7x), loose tolerance.
    out_bf16 = jax.block_until_ready(
        fwd(x, w1, g1, b1, w2, g2, b2, w3, g3, b3, use_bf16=True))
    np.testing.assert_allclose(np.asarray(out_bf16), np.asarray(ref),
                               rtol=1e-1, atol=1e-1)

    print("KERNEL_OK")
</pallas_src>

<mosaic_0001>
module attributes {stable_mosaic.version = 11 : i64} {
  func.func @_conv1x1_stats_kernel(%arg0: i32, %arg1: memref<1x32x256xf32, #tpu.memory_space<vmem>>, %arg2: memref<8x32xf32, #tpu.memory_space<vmem>>, %arg3: memref<1x8x256xf32, #tpu.memory_space<vmem>>, %arg4: memref<1x2x8xf32, #tpu.memory_space<vmem>>) attributes {dimension_semantics = [#tpu.dimension_semantics<parallel>], iteration_bounds = array<i64: 4>, scalar_prefetch = 0 : i64, scratch_operands = 0 : i64, tpu.core_type = #tpu.core_type<tc>, window_params = [{transform_indices = @transform_0, window_bounds = array<i64: 1, 32, 256>}, {pipeline_mode = #tpu.pipeline_mode<synchronous>, transform_indices = @transform_1, window_bounds = array<i64: 8, 32>}, {transform_indices = @transform_2, window_bounds = array<i64: 1, 8, 256>}, {transform_indices = @transform_3, window_bounds = array<i64: 1, 2, 8>}]} {
    %c0 = arith.constant 0 : index
    %c0_0 = arith.constant 0 : index
    %c0_1 = arith.constant 0 : index
    %0 = vector.load %arg1[%c0, %c0_0, %c0_1] : memref<1x32x256xf32, #tpu.memory_space<vmem>>, vector<1x32x256xf32>
    %c0_2 = arith.constant 0 : index
    %c0_3 = arith.constant 0 : index
    %1 = vector.load %arg2[%c0_2, %c0_3] : memref<8x32xf32, #tpu.memory_space<vmem>>, vector<8x32xf32>
    %2 = vector.shape_cast %1 : vector<8x32xf32> to vector<1x8x32xf32>
    "tpu.trace_start"() <{level = 10 : i32, message = "boc,bcl->bol"}> : () -> ()
    %cst = arith.constant dense<0.000000e+00> : vector<1x8x256xf32>
    %3 = tpu.matmul %2, %0, %cst {dimension_numbers = #tpu.dot_dimension_numbers<[2], [1], [1], [2], [0, 0, 0, 1, 1, 2], [0], [0]>} : vector<1x8x32xf32>, vector<1x32x256xf32>, vector<1x8x256xf32> -> vector<1x8x256xf32>
    "tpu.trace_stop"() : () -> ()
    %c0_4 = arith.constant 0 : index
    %c0_5 = arith.constant 0 : index
    %c0_6 = arith.constant 0 : index
    %4 = vector.load %arg3[%c0_4, %c0_5, %c0_6] : memref<1x8x256xf32, #tpu.memory_space<vmem>>, vector<1x8x256xf32>
    tpu.vector_store %arg3[%c0_4, %c0_5, %c0_6], %3 {strides = array<i32>} : memref<1x8x256xf32, #tpu.memory_space<vmem>>, vector<1x8x256xf32>,
    %cst_7 = arith.constant 1.000000e+00 : f32
    %5 = vector.broadcast %cst_7 : f32 to vector<256x1xf32>
    "tpu.trace_start"() <{level = 10 : i32, message = "bcl,lk->bck"}> : () -> ()
    %cst_8 = arith.constant dense<0.000000e+00> : vector<1x8x1xf32>
    %6 = tpu.matmul %3, %5, %cst_8 {dimension_numbers = #tpu.dot_dimension_numbers<[2], [0], [0, 1], [1], [0, 0, 0, 1, 1, 1], [], []>} : vector<1x8x256xf32>, vector<256x1xf32>, vector<1x8x1xf32> -> vector<1x8x1xf32>
    "tpu.trace_stop"() : () -> ()
    %7 = vector.shape_cast %6 : vector<1x8x1xf32> to vector<1x8xf32>
    %cst_9 = arith.constant dense<0.000000e+00> : vector<8xf32>
    %8 = vector.multi_reduction <add>, %7, %cst_9 [0] : vector<1x8xf32> to vector<8xf32>
    %9 = vector.shape_cast %8 : vector<8xf32> to vector<1x8xf32>
    "tpu.trace_start"() <{level = 10 : i32, message = "bcl,bdl->bcd"}> : () -> ()
    %cst_10 = arith.constant dense<0.000000e+00> : vector<1x8x8xf32>
    %10 = tpu.matmul %3, %3, %cst_10 {dimension_numbers = #tpu.dot_dimension_numbers<[2], [2], [1], [1], [0, 0, 0, 1, 1, 1], [0], [0]>} : vector<1x8x256xf32>, vector<1x8x256xf32>, vector<1x8x8xf32> -> vector<1x8x8xf32>
    "tpu.trace_stop"() : () -> ()
    %11 = tpu.iota {dimensions = array<i32: 0>} : vector<8x8xi32>
    %12 = tpu.iota {dimensions = array<i32: 1>} : vector<8x8xi32>
    %c0_i32 = arith.constant 0 : i32
    %13 = vector.broadcast %c0_i32 : i32 to vector<8x8xi32>
    %14 = arith.addi %11, %13 : vector<8x8xi32>
    %15 = arith.cmpi eq, %14, %12 : vector<8x8xi32>
    %16 = arith.extui %15 : vector<8x8xi1> to vector<8x8xi32>
    %17 = arith.sitofp %16 : vector<8x8xi32> to vector<8x8xf32>
    %18 = vector.shape_cast %17 : vector<8x8xf32> to vector<1x8x8xf32>
    %19 = arith.mulf %10, %18 : vector<1x8x8xf32>
    %cst_11 = arith.constant dense<0.000000e+00> : vector<1x8xf32>
    %20 = vector.multi_reduction <add>, %19, %cst_11 [2] : vector<1x8x8xf32> to vector<1x8xf32>
    %cst_12 = arith.constant dense<0.000000e+00> : vector<8xf32>
    %21 = vector.multi_reduction <add>, %20, %cst_12 [0] : vector<1x8xf32> to vector<8xf32>
    %22 = vector.shape_cast %21 : vector<8xf32> to vector<1x8xf32>
    %23 = tpu.concatenate %9, %22 in 0 : vector<1x8xf32>, vector<1x8xf32> -> vector<2x8xf32>
    %24 = vector.shape_cast %23 : vector<2x8xf32> to vector<1x2x8xf32>
    %c0_13 = arith.constant 0 : index
    %c0_14 = arith.constant 0 : index
    %c0_15 = arith.constant 0 : index
    %25 = vector.load %arg4[%c0_13, %c0_14, %c0_15] : memref<1x2x8xf32, #tpu.memory_space<vmem>>, vector<1x2x8xf32>
    tpu.vector_store %arg4[%c0_13, %c0_14, %c0_15], %24 {strides = array<i32>} : memref<1x2x8xf32, #tpu.memory_space<vmem>>, vector<1x2x8xf32>,
    return
  }
  func.func @transform_0(%arg0: i32) -> (i32, i32, i32) {
    %c0_i32 = arith.constant 0 : i32
    %c0_i32_0 = arith.constant 0 : i32
    %c0_i32_1 = arith.constant 0 : i32
    return %arg0, %c0_i32, %c0_i32_0 : i32, i32, i32
  }
  func.func @transform_1(%arg0: i32) -> (i32, i32) {
    %c0_i32 = arith.constant 0 : i32
    %c0_i32_0 = arith.constant 0 : i32
    %c0_i32_1 = arith.constant 0 : i32
    return %c0_i32, %c0_i32_0 : i32, i32
  }
  func.func @transform_2(%arg0: i32) -> (i32, i32, i32) {
    %c0_i32 = arith.constant 0 : i32
    %c0_i32_0 = arith.constant 0 : i32
    %c0_i32_1 = arith.constant 0 : i32
    return %arg0, %c0_i32, %c0_i32_0 : i32, i32, i32
  }
  func.func @transform_3(%arg0: i32) -> (i32, i32, i32) {
    %c0_i32 = arith.constant 0 : i32
    %c0_i32_0 = arith.constant 0 : i32
    %c0_i32_1 = arith.constant 0 : i32
    return %arg0, %c0_i32, %c0_i32_0 : i32, i32, i32
  }
}

module attributes {stable_mosaic.version = 11 : i64} {
  func.func @_bn_relu_conv3_stats_kernel(%arg0: i32, %arg1: memref<1x8x256xf32, #tpu.memory_space<vmem>>, %arg2: memref<1x8x1xf32, #tpu.memory_space<vmem>>, %arg3: memref<1x8x1xf32, #tpu.memory_space<vmem>>, %arg4: memref<3x8x8xf32, #tpu.memory_space<vmem>>, %arg5: memref<1x8x256xf32, #tpu.memory_space<vmem>>, %arg6: memref<1x2x8xf32, #tpu.memory_space<vmem>>) attributes {dimension_semantics = [#tpu.dimension_semantics<parallel>], iteration_bounds = array<i64: 4>, scalar_prefetch = 0 : i64, scratch_operands = 0 : i64, tpu.core_type = #tpu.core_type<tc>, window_params = [{transform_indices = @transform_0, window_bounds = array<i64: 1, 8, 256>}, {pipeline_mode = #tpu.pipeline_mode<synchronous>, transform_indices = @transform_1, window_bounds = array<i64: 1, 8, 1>}, {pipeline_mode = #tpu.pipeline_mode<synchronous>, transform_indices = @transform_2, window_bounds = array<i64: 1, 8, 1>}, {pipeline_mode = #tpu.pipeline_mode<synchronous>, transform_indices = @transform_3, window_bounds = array<i64: 3, 8, 8>}, {transform_indices = @transform_4, window_bounds = array<i64: 1, 8, 256>}, {transform_indices = @transform_5, window_bounds = array<i64: 1, 2, 8>}]} {
    %c0 = arith.constant 0 : index
    %c0_0 = arith.constant 0 : index
    %c0_1 = arith.constant 0 : index
    %0 = vector.load %arg1[%c0, %c0_0, %c0_1] : memref<1x8x256xf32, #tpu.memory_space<vmem>>, vector<1x8x256xf32>
    %c0_2 = arith.constant 0 : index
    %c0_3 = arith.constant 0 : index
    %c0_4 = arith.constant 0 : index
    %1 = vector.load %arg2[%c0_2, %c0_3, %c0_4] : memref<1x8x1xf32, #tpu.memory_space<vmem>>, vector<1x8x1xf32>
    %2 = vector.broadcast %1 : vector<1x8x1xf32> to vector<1x8x256xf32>
    %3 = arith.mulf %0, %2 : vector<1x8x256xf32>
    %c0_5 = arith.constant 0 : index
    %c0_6 = arith.constant 0 : index
    %c0_7 = arith.constant 0 : index
    %4 = vector.load %arg3[%c0_5, %c0_6, %c0_7] : memref<1x8x1xf32, #tpu.memory_space<vmem>>, vector<1x8x1xf32>
    %5 = vector.broadcast %4 : vector<1x8x1xf32> to vector<1x8x256xf32>
    %6 = arith.addf %3, %5 : vector<1x8x256xf32>
    %cst = arith.constant 0.000000e+00 : f32
    %7 = vector.broadcast %cst : f32 to vector<1x8x256xf32>
    %8 = arith.maximumf %6, %7 : vector<1x8x256xf32>
    %9 = tpu.iota {dimensions = array<i32: 2>} : vector<1x1x256xi32>
    %c0_i32 = arith.constant 0 : i32
    %10 = vector.broadcast %c0_i32 : i32 to vector<1x1x256xi32>
    %11 = arith.cmpi eq, %9, %10 : vector<1x1x256xi32>
    %c1_i32 = arith.constant 1 : i32
    %12 = tpu.dynamic_rotate %8 by %c1_i32 dim 2 : vector<1x8x256xf32>, i32 -> vector<1x8x256xf32>
    %cst_8 = arith.constant 0.000000e+00 : f32
    %13 = vector.shape_cast %11 : vector<1x1x256xi1> to vector<1x1x256xi1>
    %14 = vector.broadcast %13 : vector<1x1x256xi1> to vector<1x8x256xi1>
    %15 = vector.broadcast %cst_8 : f32 to vector<1x8x256xf32>
    %16 = arith.select %14, %15, %12 : vector<1x8x256xi1>, vector<1x8x256xf32>
    %c255_i32 = arith.constant 255 : i32
    %17 = vector.broadcast %c255_i32 : i32 to vector<1x1x256xi32>
    %18 = arith.cmpi eq, %9, %17 : vector<1x1x256xi32>
    %c255_i32_9 = arith.constant 255 : i32
    %19 = tpu.dynamic_rotate %8 by %c255_i32_9 dim 2 : vector<1x8x256xf32>, i32 -> vector<1x8x256xf32>
    %cst_10 = arith.constant 0.000000e+00 : f32
    %20 = vector.shape_cast %18 : vector<1x1x256xi1> to vector<1x1x256xi1>
    %21 = vector.broadcast %20 : vector<1x1x256xi1> to vector<1x8x256xi1>
    %22 = vector.broadcast %cst_10 : f32 to vector<1x8x256xf32>
    %23 = arith.select %21, %22, %19 : vector<1x8x256xi1>, vector<1x8x256xf32>
    %c0_11 = arith.constant 0 : index
    %c0_12 = arith.constant 0 : index
    %c0_13 = arith.constant 0 : index
    %24 = vector.load %arg4[%c0_11, %c0_12, %c0_13] : memref<3x8x8xf32, #tpu.memory_space<vmem>>, vector<1x8x8xf32>
    %25 = vector.shape_cast %24 : vector<1x8x8xf32> to vector<8x8xf32>
    %26 = vector.shape_cast %25 : vector<8x8xf32> to vector<1x8x8xf32>
    "tpu.trace_start"() <{level = 10 : i32, message = "boc,bcl->bol"}> : () -> ()
    %cst_14 = arith.constant dense<0.000000e+00> : vector<1x8x256xf32>
    %27 = tpu.matmul %26, %16, %cst_14 {dimension_numbers = #tpu.dot_dimension_numbers<[2], [1], [1], [2], [0, 0, 0, 1, 1, 2], [0], [0]>} : vector<1x8x8xf32>, vector<1x8x256xf32>, vector<1x8x256xf32> -> vector<1x8x256xf32>
    "tpu.trace_stop"() : () -> ()
    %c1 = arith.constant 1 : index
    %c0_15 = arith.constant 0 : index
    %c0_16 = arith.constant 0 : index
    %28 = vector.load %arg4[%c1, %c0_15, %c0_16] : memref<3x8x8xf32, #tpu.memory_space<vmem>>, vector<1x8x8xf32>
    %29 = vector.shape_cast %28 : vector<1x8x8xf32> to vector<8x8xf32>
    %30 = vector.shape_cast %29 : vector<8x8xf32> to vector<1x8x8xf32>
    "tpu.trace_start"() <{level = 10 : i32, message = "boc,bcl->bol"}> : () -> ()
    %cst_17 = arith.constant dense<0.000000e+00> : vector<1x8x256xf32>
    %31 = tpu.matmul %30, %8, %cst_17 {dimension_numbers = #tpu.dot_dimension_numbers<[2], [1], [1], [2], [0, 0, 0, 1, 1, 2], [0], [0]>} : vector<1x8x8xf32>, vector<1x8x256xf32>, vector<1x8x256xf32> -> vector<1x8x256xf32>
    "tpu.trace_stop"() : () -> ()
    %32 = arith.addf %27, %31 : vector<1x8x256xf32>
    %c2 = arith.constant 2 : index
    %c0_18 = arith.constant 0 : index
    %c0_19 = arith.constant 0 : index
    %33 = vector.load %arg4[%c2, %c0_18, %c0_19] : memref<3x8x8xf32, #tpu.memory_space<vmem>>, vector<1x8x8xf32>
    %34 = vector.shape_cast %33 : vector<1x8x8xf32> to vector<8x8xf32>
    %35 = vector.shape_cast %34 : vector<8x8xf32> to vector<1x8x8xf32>
    "tpu.trace_start"() <{level = 10 : i32, message = "boc,bcl->bol"}> : () -> ()
    %cst_20 = arith.constant dense<0.000000e+00> : vector<1x8x256xf32>
    %36 = tpu.matmul %35, %23, %cst_20 {dimension_numbers = #tpu.dot_dimension_numbers<[2], [1], [1], [2], [0, 0, 0, 1, 1, 2], [0], [0]>} : vector<1x8x8xf32>, vector<1x8x256xf32>, vector<1x8x256xf32> -> vector<1x8x256xf32>
    "tpu.trace_stop"() : () -> ()
    %37 = arith.addf %32, %36 : vector<1x8x256xf32>
    %c0_21 = arith.constant 0 : index
    %c0_22 = arith.constant 0 : index
    %c0_23 = arith.constant 0 : index
    %38 = vector.load %arg5[%c0_21, %c0_22, %c0_23] : memref<1x8x256xf32, #tpu.memory_space<vmem>>, vector<1x8x256xf32>
    tpu.vector_store %arg5[%c0_21, %c0_22, %c0_23], %37 {strides = array<i32>} : memref<1x8x256xf32, #tpu.memory_space<vmem>>, vector<1x8x256xf32>,
    %cst_24 = arith.constant 1.000000e+00 : f32
    %39 = vector.broadcast %cst_24 : f32 to vector<256x1xf32>
    "tpu.trace_start"() <{level = 10 : i32, message = "bcl,lk->bck"}> : () -> ()
    %cst_25 = arith.constant dense<0.000000e+00> : vector<1x8x1xf32>
    %40 = tpu.matmul %37, %39, %cst_25 {dimension_numbers = #tpu.dot_dimension_numbers<[2], [0], [0, 1], [1], [0, 0, 0, 1, 1, 1], [], []>} : vector<1x8x256xf32>, vector<256x1xf32>, vector<1x8x1xf32> -> vector<1x8x1xf32>
    "tpu.trace_stop"() : () -> ()
    %41 = vector.shape_cast %40 : vector<1x8x1xf32> to vector<1x8xf32>
    %cst_26 = arith.constant dense<0.000000e+00> : vector<8xf32>
    %42 = vector.multi_reduction <add>, %41, %cst_26 [0] : vector<1x8xf32> to vector<8xf32>
    %43 = vector.shape_cast %42 : vector<8xf32> to vector<1x8xf32>
    "tpu.trace_start"() <{level = 10 : i32, message = "bcl,bdl->bcd"}> : () -> ()
    %cst_27 = arith.constant dense<0.000000e+00> : vector<1x8x8xf32>
    %44 = tpu.matmul %37, %37, %cst_27 {dimension_numbers = #tpu.dot_dimension_numbers<[2], [2], [1], [1], [0, 0, 0, 1, 1, 1], [0], [0]>} : vector<1x8x256xf32>, vector<1x8x256xf32>, vector<1x8x8xf32> -> vector<1x8x8xf32>
    "tpu.trace_stop"() : () -> ()
    %45 = tpu.iota {dimensions = array<i32: 0>} : vector<8x8xi32>
    %46 = tpu.iota {dimensions = array<i32: 1>} : vector<8x8xi32>
    %c0_i32_28 = arith.constant 0 : i32
    %47 = vector.broadcast %c0_i32_28 : i32 to vector<8x8xi32>
    %48 = arith.addi %45, %47 : vector<8x8xi32>
    %49 = arith.cmpi eq, %48, %46 : vector<8x8xi32>
    %50 = arith.extui %49 : vector<8x8xi1> to vector<8x8xi32>
    %51 = arith.sitofp %50 : vector<8x8xi32> to vector<8x8xf32>
    %52 = vector.shape_cast %51 : vector<8x8xf32> to vector<1x8x8xf32>
    %53 = arith.mulf %44, %52 : vector<1x8x8xf32>
    %cst_29 = arith.constant dense<0.000000e+00> : vector<1x8xf32>
    %54 = vector.multi_reduction <add>, %53, %cst_29 [2] : vector<1x8x8xf32> to vector<1x8xf32>
    %cst_30 = arith.constant dense<0.000000e+00> : vector<8xf32>
    %55 = vector.multi_reduction <add>, %54, %cst_30 [0] : vector<1x8xf32> to vector<8xf32>
    %56 = vector.shape_cast %55 : vector<8xf32> to vector<1x8xf32>
    %57 = tpu.concatenate %43, %56 in 0 : vector<1x8xf32>, vector<1x8xf32> -> vector<2x8xf32>
    %58 = vector.shape_cast %57 : vector<2x8xf32> to vector<1x2x8xf32>
    %c0_31 = arith.constant 0 : index
    %c0_32 = arith.constant 0 : index
    %c0_33 = arith.constant 0 : index
    %59 = vector.load %arg6[%c0_31, %c0_32, %c0_33] : memref<1x2x8xf32, #tpu.memory_space<vmem>>, vector<1x2x8xf32>
    tpu.vector_store %arg6[%c0_31, %c0_32, %c0_33], %58 {strides = array<i32>} : memref<1x2x8xf32, #tpu.memory_space<vmem>>, vector<1x2x8xf32>,
    return
  }
  func.func @transform_0(%arg0: i32) -> (i32, i32, i32) {
    %c0_i32 = arith.constant 0 : i32
    %c0_i32_0 = arith.constant 0 : i32
    %c0_i32_1 = arith.constant 0 : i32
    return %arg0, %c0_i32, %c0_i32_0 : i32, i32, i32
  }
  func.func @transform_1(%arg0: i32) -> (i32, i32, i32) {
    %c0_i32 = arith.constant 0 : i32
    %c0_i32_0 = arith.constant 0 : i32
    %c0_i32_1 = arith.constant 0 : i32
    %c0_i32_2 = arith.constant 0 : i32
    return %c0_i32, %c0_i32_0, %c0_i32_1 : i32, i32, i32
  }
  func.func @transform_2(%arg0: i32) -> (i32, i32, i32) {
    %c0_i32 = arith.constant 0 : i32
    %c0_i32_0 = arith.constant 0 : i32
    %c0_i32_1 = arith.constant 0 : i32
    %c0_i32_2 = arith.constant 0 : i32
    return %c0_i32, %c0_i32_0, %c0_i32_1 : i32, i32, i32
  }
  func.func @transform_3(%arg0: i32) -> (i32, i32, i32) {
    %c0_i32 = arith.constant 0 : i32
    %c0_i32_0 = arith.constant 0 : i32
    %c0_i32_1 = arith.constant 0 : i32
    %c0_i32_2 = arith.constant 0 : i32
    return %c0_i32, %c0_i32_0, %c0_i32_1 : i32, i32, i32
  }
  func.func @transform_4(%arg0: i32) -> (i32, i32, i32) {
    %c0_i32 = arith.constant 0 : i32
    %c0_i32_0 = arith.constant 0 : i32
    %c0_i32_1 = arith.constant 0 : i32
    return %arg0, %c0_i32, %c0_i32_0 : i32, i32, i32
  }
  func.func @transform_5(%arg0: i32) -> (i32, i32, i32) {
    %c0_i32 = arith.constant 0 : i32
    %c0_i32_0 = arith.constant 0 : i32
    %c0_i32_1 = arith.constant 0 : i32
    return %arg0, %c0_i32, %c0_i32_0 : i32, i32, i32
  }
}

module attributes {stable_mosaic.version = 11 : i64} {
  func.func @_a2_stats_kernel(%arg0: i32, %arg1: memref<1x8x256xf32, #tpu.memory_space<vmem>>, %arg2: memref<1x8x1xf32, #tpu.memory_space<vmem>>, %arg3: memref<1x8x1xf32, #tpu.memory_space<vmem>>, %arg4: memref<1x1x8xf32, #tpu.memory_space<vmem>>, %arg5: memref<1x8x8xf32, #tpu.memory_space<vmem>>) attributes {dimension_semantics = [#tpu.dimension_semantics<parallel>], iteration_bounds = array<i64: 4>, scalar_prefetch = 0 : i64, scratch_operands = 0 : i64, tpu.core_type = #tpu.core_type<tc>, window_params = [{transform_indices = @transform_0, window_bounds = array<i64: 1, 8, 256>}, {pipeline_mode = #tpu.pipeline_mode<synchronous>, transform_indices = @transform_1, window_bounds = array<i64: 1, 8, 1>}, {pipeline_mode = #tpu.pipeline_mode<synchronous>, transform_indices = @transform_2, window_bounds = array<i64: 1, 8, 1>}, {transform_indices = @transform_3, window_bounds = array<i64: 1, 1, 8>}, {transform_indices = @transform_4, window_bounds = array<i64: 1, 8, 8>}]} {
    %c0 = arith.constant 0 : index
    %c0_0 = arith.constant 0 : index
    %c0_1 = arith.constant 0 : index
    %0 = vector.load %arg1[%c0, %c0_0, %c0_1] : memref<1x8x256xf32, #tpu.memory_space<vmem>>, vector<1x8x256xf32>
    %c0_2 = arith.constant 0 : index
    %c0_3 = arith.constant 0 : index
    %c0_4 = arith.constant 0 : index
    %1 = vector.load %arg2[%c0_2, %c0_3, %c0_4] : memref<1x8x1xf32, #tpu.memory_space<vmem>>, vector<1x8x1xf32>
    %2 = vector.broadcast %1 : vector<1x8x1xf32> to vector<1x8x256xf32>
    %3 = arith.mulf %0, %2 : vector<1x8x256xf32>
    %c0_5 = arith.constant 0 : index
    %c0_6 = arith.constant 0 : index
    %c0_7 = arith.constant 0 : index
    %4 = vector.load %arg3[%c0_5, %c0_6, %c0_7] : memref<1x8x1xf32, #tpu.memory_space<vmem>>, vector<1x8x1xf32>
    %5 = vector.broadcast %4 : vector<1x8x1xf32> to vector<1x8x256xf32>
    %6 = arith.addf %3, %5 : vector<1x8x256xf32>
    %cst = arith.constant 0.000000e+00 : f32
    %7 = vector.broadcast %cst : f32 to vector<1x8x256xf32>
    %8 = arith.maximumf %6, %7 : vector<1x8x256xf32>
    %cst_8 = arith.constant 1.000000e+00 : f32
    %9 = vector.broadcast %cst_8 : f32 to vector<256x1xf32>
    "tpu.trace_start"() <{level = 10 : i32, message = "bcl,lk->bck"}> : () -> ()
    %cst_9 = arith.constant dense<0.000000e+00> : vector<1x8x1xf32>
    %10 = tpu.matmul %8, %9, %cst_9 {dimension_numbers = #tpu.dot_dimension_numbers<[2], [0], [0, 1], [1], [0, 0, 0, 1, 1, 1], [], []>} : vector<1x8x256xf32>, vector<256x1xf32>, vector<1x8x1xf32> -> vector<1x8x1xf32>
    "tpu.trace_stop"() : () -> ()
    %11 = vector.shape_cast %10 : vector<1x8x1xf32> to vector<1x8xf32>
    %cst_10 = arith.constant dense<0.000000e+00> : vector<8xf32>
    %12 = vector.multi_reduction <add>, %11, %cst_10 [0] : vector<1x8xf32> to vector<8xf32>
    %13 = vector.shape_cast %12 : vector<8xf32> to vector<1x8xf32>
    %14 = vector.shape_cast %13 : vector<1x8xf32> to vector<1x1x8xf32>
    %c0_11 = arith.constant 0 : index
    %c0_12 = arith.constant 0 : index
    %c0_13 = arith.constant 0 : index
    %15 = vector.load %arg4[%c0_11, %c0_12, %c0_13] : memref<1x1x8xf32, #tpu.memory_space<vmem>>, vector<1x1x8xf32>
    tpu.vector_store %arg4[%c0_11, %c0_12, %c0_13], %14 {strides = array<i32>} : memref<1x1x8xf32, #tpu.memory_space<vmem>>, vector<1x1x8xf32>,
    "tpu.trace_start"() <{level = 10 : i32, message = "bcl,bdl->bcd"}> : () -> ()
    %cst_14 = arith.constant dense<0.000000e+00> : vector<1x8x8xf32>
    %16 = tpu.matmul %8, %8, %cst_14 {dimension_numbers = #tpu.dot_dimension_numbers<[2], [2], [1], [1], [0, 0, 0, 1, 1, 1], [0], [0]>} : vector<1x8x256xf32>, vector<1x8x256xf32>, vector<1x8x8xf32> -> vector<1x8x8xf32>
    "tpu.trace_stop"() : () -> ()
    %cst_15 = arith.constant dense<0.000000e+00> : vector<8x8xf32>
    %17 = vector.multi_reduction <add>, %16, %cst_15 [0] : vector<1x8x8xf32> to vector<8x8xf32>
    %18 = vector.shape_cast %17 : vector<8x8xf32> to vector<1x8x8xf32>
    %c0_16 = arith.constant 0 : index
    %c0_17 = arith.constant 0 : index
    %c0_18 = arith.constant 0 : index
    %19 = vector.load %arg5[%c0_16, %c0_17, %c0_18] : memref<1x8x8xf32, #tpu.memory_space<vmem>>, vector<1x8x8xf32>
    tpu.vector_store %arg5[%c0_16, %c0_17, %c0_18], %18 {strides = array<i32>} : memref<1x8x8xf32, #tpu.memory_space<vmem>>, vector<1x8x8xf32>,
    return
  }
  func.func @transform_0(%arg0: i32) -> (i32, i32, i32) {
    %c0_i32 = arith.constant 0 : i32
    %c0_i32_0 = arith.constant 0 : i32
    %c0_i32_1 = arith.constant 0 : i32
    return %arg0, %c0_i32, %c0_i32_0 : i32, i32, i32
  }
  func.func @transform_1(%arg0: i32) -> (i32, i32, i32) {
    %c0_i32 = arith.constant 0 : i32
    %c0_i32_0 = arith.constant 0 : i32
    %c0_i32_1 = arith.constant 0 : i32
    %c0_i32_2 = arith.constant 0 : i32
    return %c0_i32, %c0_i32_0, %c0_i32_1 : i32, i32, i32
  }
  func.func @transform_2(%arg0: i32) -> (i32, i32, i32) {
    %c0_i32 = arith.constant 0 : i32
    %c0_i32_0 = arith.constant 0 : i32
    %c0_i32_1 = arith.constant 0 : i32
    %c0_i32_2 = arith.constant 0 : i32
    return %c0_i32, %c0_i32_0, %c0_i32_1 : i32, i32, i32
  }
  func.func @transform_3(%arg0: i32) -> (i32, i32, i32) {
    %c0_i32 = arith.constant 0 : i32
    %c0_i32_0 = arith.constant 0 : i32
    %c0_i32_1 = arith.constant 0 : i32
    return %arg0, %c0_i32, %c0_i32_0 : i32, i32, i32
  }
  func.func @transform_4(%arg0: i32) -> (i32, i32, i32) {
    %c0_i32 = arith.constant 0 : i32
    %c0_i32_0 = arith.constant 0 : i32
    %c0_i32_1 = arith.constant 0 : i32
    return %arg0, %c0_i32, %c0_i32_0 : i32, i32, i32
  }
}

module attributes {stable_mosaic.version = 11 : i64} {
  func.func @_conv1x1_bn_residual_relu_kernel(%arg0: i32, %arg1: memref<1x8x256xf32, #tpu.memory_space<vmem>>, %arg2: memref<1x32x256xf32, #tpu.memory_space<vmem>>, %arg3: memref<1x8x1xf32, #tpu.memory_space<vmem>>, %arg4: memref<1x8x1xf32, #tpu.memory_space<vmem>>, %arg5: memref<32x8xf32, #tpu.memory_space<vmem>>, %arg6: memref<1x32x1xf32, #tpu.memory_space<vmem>>, %arg7: memref<1x32x1xf32, #tpu.memory_space<vmem>>, %arg8: memref<1x32x256xf32, #tpu.memory_space<vmem>>) attributes {dimension_semantics = [#tpu.dimension_semantics<parallel>], iteration_bounds = array<i64: 4>, scalar_prefetch = 0 : i64, scratch_operands = 0 : i64, tpu.core_type = #tpu.core_type<tc>, window_params = [{transform_indices = @transform_0, window_bounds = array<i64: 1, 8, 256>}, {transform_indices = @transform_1, window_bounds = array<i64: 1, 32, 256>}, {pipeline_mode = #tpu.pipeline_mode<synchronous>, transform_indices = @transform_2, window_bounds = array<i64: 1, 8, 1>}, {pipeline_mode = #tpu.pipeline_mode<synchronous>, transform_indices = @transform_3, window_bounds = array<i64: 1, 8, 1>}, {pipeline_mode = #tpu.pipeline_mode<synchronous>, transform_indices = @transform_4, window_bounds = array<i64: 32, 8>}, {pipeline_mode = #tpu.pipeline_mode<synchronous>, transform_indices = @transform_5, window_bounds = array<i64: 1, 32, 1>}, {pipeline_mode = #tpu.pipeline_mode<synchronous>, transform_indices = @transform_6, window_bounds = array<i64: 1, 32, 1>}, {transform_indices = @transform_7, window_bounds = array<i64: 1, 32, 256>}]} {
    %c0 = arith.constant 0 : index
    %c0_0 = arith.constant 0 : index
    %c0_1 = arith.constant 0 : index
    %0 = vector.load %arg1[%c0, %c0_0, %c0_1] : memref<1x8x256xf32, #tpu.memory_space<vmem>>, vector<1x8x256xf32>
    %c0_2 = arith.constant 0 : index
    %c0_3 = arith.constant 0 : index
    %c0_4 = arith.constant 0 : index
    %1 = vector.load %arg3[%c0_2, %c0_3, %c0_4] : memref<1x8x1xf32, #tpu.memory_space<vmem>>, vector<1x8x1xf32>
    %2 = vector.broadcast %1 : vector<1x8x1xf32> to vector<1x8x256xf32>
    %3 = arith.mulf %0, %2 : vector<1x8x256xf32>
    %c0_5 = arith.constant 0 : index
    %c0_6 = arith.constant 0 : index
    %c0_7 = arith.constant 0 : index
    %4 = vector.load %arg4[%c0_5, %c0_6, %c0_7] : memref<1x8x1xf32, #tpu.memory_space<vmem>>, vector<1x8x1xf32>
    %5 = vector.broadcast %4 : vector<1x8x1xf32> to vector<1x8x256xf32>
    %6 = arith.addf %3, %5 : vector<1x8x256xf32>
    %cst = arith.constant 0.000000e+00 : f32
    %7 = vector.broadcast %cst : f32 to vector<1x8x256xf32>
    %8 = arith.maximumf %6, %7 : vector<1x8x256xf32>
    %c0_8 = arith.constant 0 : index
    %c0_9 = arith.constant 0 : index
    %9 = vector.load %arg5[%c0_8, %c0_9] : memref<32x8xf32, #tpu.memory_space<vmem>>, vector<32x8xf32>
    %10 = vector.shape_cast %9 : vector<32x8xf32> to vector<1x32x8xf32>
    "tpu.trace_start"() <{level = 10 : i32, message = "boc,bcl->bol"}> : () -> ()
    %cst_10 = arith.constant dense<0.000000e+00> : vector<1x32x256xf32>
    %11 = tpu.matmul %10, %8, %cst_10 {dimension_numbers = #tpu.dot_dimension_numbers<[2], [1], [1], [2], [0, 0, 0, 1, 1, 2], [0], [0]>} : vector<1x32x8xf32>, vector<1x8x256xf32>, vector<1x32x256xf32> -> vector<1x32x256xf32>
    "tpu.trace_stop"() : () -> ()
    %c0_11 = arith.constant 0 : index
    %c0_12 = arith.constant 0 : index
    %c0_13 = arith.constant 0 : index
    %12 = vector.load %arg6[%c0_11, %c0_12, %c0_13] : memref<1x32x1xf32, #tpu.memory_space<vmem>>, vector<1x32x1xf32>
    %13 = vector.broadcast %12 : vector<1x32x1xf32> to vector<1x32x256xf32>
    %14 = arith.mulf %11, %13 : vector<1x32x256xf32>
    %c0_14 = arith.constant 0 : index
    %c0_15 = arith.constant 0 : index
    %c0_16 = arith.constant 0 : index
    %15 = vector.load %arg7[%c0_14, %c0_15, %c0_16] : memref<1x32x1xf32, #tpu.memory_space<vmem>>, vector<1x32x1xf32>
    %16 = vector.broadcast %15 : vector<1x32x1xf32> to vector<1x32x256xf32>
    %17 = arith.addf %14, %16 : vector<1x32x256xf32>
    %c0_17 = arith.constant 0 : index
    %c0_18 = arith.constant 0 : index
    %c0_19 = arith.constant 0 : index
    %18 = vector.load %arg2[%c0_17, %c0_18, %c0_19] : memref<1x32x256xf32, #tpu.memory_space<vmem>>, vector<1x32x256xf32>
    %19 = arith.addf %17, %18 : vector<1x32x256xf32>
    %cst_20 = arith.constant 0.000000e+00 : f32
    %20 = vector.broadcast %cst_20 : f32 to vector<1x32x256xf32>
    %21 = arith.maximumf %19, %20 : vector<1x32x256xf32>
    %c0_21 = arith.constant 0 : index
    %c0_22 = arith.constant 0 : index
    %c0_23 = arith.constant 0 : index
    %22 = vector.load %arg8[%c0_21, %c0_22, %c0_23] : memref<1x32x256xf32, #tpu.memory_space<vmem>>, vector<1x32x256xf32>
    tpu.vector_store %arg8[%c0_21, %c0_22, %c0_23], %21 {strides = array<i32>} : memref<1x32x256xf32, #tpu.memory_space<vmem>>, vector<1x32x256xf32>,
    return
  }
  func.func @transform_0(%arg0: i32) -> (i32, i32, i32) {
    %c0_i32 = arith.constant 0 : i32
    %c0_i32_0 = arith.constant 0 : i32
    %c0_i32_1 = arith.constant 0 : i32
    return %arg0, %c0_i32, %c0_i32_0 : i32, i32, i32
  }
  func.func @transform_1(%arg0: i32) -> (i32, i32, i32) {
    %c0_i32 = arith.constant 0 : i32
    %c0_i32_0 = arith.constant 0 : i32
    %c0_i32_1 = arith.constant 0 : i32
    return %arg0, %c0_i32, %c0_i32_0 : i32, i32, i32
  }
  func.func @transform_2(%arg0: i32) -> (i32, i32, i32) {
    %c0_i32 = arith.constant 0 : i32
    %c0_i32_0 = arith.constant 0 : i32
    %c0_i32_1 = arith.constant 0 : i32
    %c0_i32_2 = arith.constant 0 : i32
    return %c0_i32, %c0_i32_0, %c0_i32_1 : i32, i32, i32
  }
  func.func @transform_3(%arg0: i32) -> (i32, i32, i32) {
    %c0_i32 = arith.constant 0 : i32
    %c0_i32_0 = arith.constant 0 : i32
    %c0_i32_1 = arith.constant 0 : i32
    %c0_i32_2 = arith.constant 0 : i32
    return %c0_i32, %c0_i32_0, %c0_i32_1 : i32, i32, i32
  }
  func.func @transform_4(%arg0: i32) -> (i32, i32) {
    %c0_i32 = arith.constant 0 : i32
    %c0_i32_0 = arith.constant 0 : i32
    %c0_i32_1 = arith.constant 0 : i32
    return %c0_i32, %c0_i32_0 : i32, i32
  }
  func.func @transform_5(%arg0: i32) -> (i32, i32, i32) {
    %c0_i32 = arith.constant 0 : i32
    %c0_i32_0 = arith.constant 0 : i32
    %c0_i32_1 = arith.constant 0 : i32
    %c0_i32_2 = arith.constant 0 : i32
    return %c0_i32, %c0_i32_0, %c0_i32_1 : i32, i32, i32
  }
  func.func @transform_6(%arg0: i32) -> (i32, i32, i32) {
    %c0_i32 = arith.constant 0 : i32
    %c0_i32_0 = arith.constant 0 : i32
    %c0_i32_1 = arith.constant 0 : i32
    %c0_i32_2 = arith.constant 0 : i32
    return %c0_i32, %c0_i32_0, %c0_i32_1 : i32, i32, i32
  }
  func.func @transform_7(%arg0: i32) -> (i32, i32, i32) {
    %c0_i32 = arith.constant 0 : i32
    %c0_i32_0 = arith.constant 0 : i32
    %c0_i32_1 = arith.constant 0 : i32
    return %arg0, %c0_i32, %c0_i32_0 : i32, i32, i32
  }
}

</mosaic_0001>

<bundles_post_ra>
// kernel: bottleneck_forward.4
= control target key start
LH: loop header
LB: loop body
LE: loop exit
PB: predicated region body
PF: predicated region fallthrough
CT: control target
= control target key end

     0   :  { %9 = vsyncpa [#allocation3], 0  ;;  %s890_s0 = inlined_call_operand.hbm [shape: f32[4,32,256], index: 0, kind: input, shape index: {}]   ;;  %s891_s1 = inlined_call_operand.vmem [shape: f32[8,32], index: 1, kind: input, shape index: {}]   ;;  %s892_s2 = inlined_call_operand.vmem [shape: f32[4,8,256], index: 2, kind: output, shape index: {0}]   ;;  %s893_s3 = inlined_call_operand.vmem [shape: f32[4,2,8], index: 3, kind: output, shape index: {1}]  }
   0x1   :  { %11 = vsyncpa [#allocation3 + $0x1], 0  ;;  %s772_s12 = smov 0   ;;  %s774_s13 = smov 0  }
   0x2   :  { %s776_s14 = smov 0   ;;  %s778_s15 = smov 0  }
   0x3 LB: > { %s791_s16 = sadd.s32 4294967295, %s744_s15   ;;  %s794_s17 = sadd.s32 1, %s744_s15   ;;  %s744_s15 = sphi %s778_s15, %s900_s15   ;;  %s740_s14 = sphi %s776_s14, %s899_s14   ;;  %s736_s13 = sphi %s774_s13, %s898_s13   ;;  %s732_s12 = sphi %s772_s12, %s897_s12  }
   0x4   : > { %s21_s18 = ssub.s32 %s744_s15, %s794_s17  ;;  %s24_s19 = sadd.s32 1, %s740_s14 }
   0x5   : > { %p22_p0 = scmp.eq.s32.totalorder %s21_s18, 0  ;;  %p31_p1 = scmp.ne.s32.totalorder %s740_s14, %s736_s13 }
   0x6   : > { %p32_p2 = scmp.eq.s32.totalorder %s744_s15, 0  ;;  %p37_p3 = scmp.ne.s32.totalorder %s736_s13, %s732_s12 }
   0x7   : > { %s804_s20 = scalar_select %p22_p0, %s740_s14, %s24_s19  }
   0x8   : > { %p33_p4 = por %p32_p2, %p31_p1  ;;  %p38_p5 = scmp.eq.s32.totalorder %s791_s16, 0 }
   0x9   : > { %p641_p6 = scmp.lt.s32.totalorder %s744_s15, 4  ;;  %s137_s22 = sand.u32 1, %s740_s14  }
   0xa   : > { %p808_p7 = por %p38_p5, %p37_p3  ;;  %s562_s23 = sshll.u32 %s137_s22, 6 }
   0xb   : > { %s574_s24 = sshll.u32 %s744_s15, 10  ;;  %s141_s28 = scalar_lea.vmem [#allocation2], %s562_s23 }
   0xc   : > { %s817_s27 = scalar_lea.hbm %s890_s0, %s574_s24  ;;  %s148_s29 = sshll.u32 %s141_s28, 4  ;;  %s819_s29 = int_to_ptr.vmem [resolvable:$true] %s148_s29 }
   0xd   : > { %p821_p8 = pnand %p641_p6, %p33_p4  ;;  %s826_s4 = scalar_lea.sflag [#allocation3], %s137_s22 }
   0xe   : > { %s680_s5 = scalar_lea.hbm %s817_s27, 1024  ;;  %s685_s8 = scalar_lea.hbm %s890_s0, 4096 }
   0xf   : > { %p681_p10 = scmp.ne.s32.totalorder %s817_s27, %s680_s5  ;;  %p682_p11 = pneg %p821_p8 }
  0x10   : > { %p686_p0 = scmp.lt.u32.totalorder %s817_s27, %s890_s0  ;;  %p687_p1 = scmp.lt.u32.totalorder %s685_s8, %s680_s5 }
  0x11   : > { %p683_p12 = pnand %p682_p11, %p681_p10  ;;  %p689_p3 = scmp.lt.u32.totalorder %s680_s5, %s817_s27 }
  0x12   : > { %p688_p2 = por %p687_p1, %p686_p0 }
  0x13   : > { %p684_p13 = pneg %p683_p12 }
  0x14   : > { %p690_p4 = por %p689_p3, %p688_p2 }
  0x16   : > { %p691_p5 = pnand %p690_p4, %p684_p13 }
  0x18   : > { %694 = shalt.err (!%p691_p5)
}
  0x19   : > { %s695_s11 = scalar_lea.vmem %s819_s29, 1024  ;;  %s746_s12 = smov [#allocation2]  }
  0x1a   : > { %p696_p6 = scmp.ne.s32.totalorder %s819_s29, %s695_s11  ;;  %s700_s18 = sshll.u32 %s746_s12, 4  ;;  %s701_s18 = int_to_ptr.vmem [resolvable:$false] %s700_s18 }
  0x1b   : > { %s702_s19 = scalar_lea.vmem %s701_s18, 2048  ;;  %p703_p9 = scmp.lt.s32.totalorder %s819_s29, %s701_s18 }
  0x1c   : > { %p698_p10 = pnand %p696_p6, %p682_p11  ;;  %p704_p0 = scmp.lt.s32.totalorder %s702_s19, %s695_s11 }
  0x1e   : > { %p699_p12 = pneg %p698_p10  ;;  %p705_p1 = por %p704_p0, %p703_p9 }
  0x20   : > { %p706_p2 = pnand %p705_p1, %p699_p12 }
  0x22   : > { %709 = shalt.err (!%p706_p2)
}
  0x23   : > { %s747_s22 = smov 256   ;;  %s748_s23 = smov 16  }
  0x24   : > { %640 = dma.hbm_to_vmem [thread:$0]  (!%p821_p8), %s817_s27, 1024, %s819_s29, %s826_s4, %s747_s22, %s747_s22, %s748_s23  }
  0x25   : > { %p156_p11 = scmp.lt.s32.totalorder %s744_s15, 5  ;;  %p896_p13 = scmp.ge.s32.totalorder %s744_s15, 1 }
  0x27   : > { %p157_p3 = pnand %p896_p13, %p156_p11 }
  0x28   : > { %s162_s24 = sand.u32 (!%p157_p3), 1, %s736_s13  }
  0x29   : > { %160 = sbr.rel (%p157_p3) target bundleno = 647 (0x287), region = 28  ;;  %s566_s25 = sshll.u32 (!%p157_p3), %s162_s24, 6 }
  0x2a   : > { %s163_s26 = scalar_lea.sflag (!%p157_p3), [#allocation3], %s162_s24  ;;  %s166_s28 = scalar_lea.vmem (!%p157_p3), [#allocation2], %s566_s25 }
  0x30   : > { %727 = dma.done.wait (%p808_p7), %s163_s26, 1024  }
  0x31   : > { %729 = vsyncadd (%p808_p7), %s163_s26, 4294966272  ;;  %v749_v0 = vmov 0.0   ;;  %v750_v1 = vmov 1.0|1.0   ;;  %v203_v2 = vld [vmem:[%s166_s28 + $0x8] sm:$0xff]  ;;  %v205_v3 = vld [vmem:[%s166_s28 + $0x18] sm:$0xff]  ;;  %v429_v18 = vlaneseq }
  0x32   : > { %279 = vmatprep.mubr.f32.mxu0 %v749_v0  ;;  %619 = vmatprep.subr.bf16.mxu1 %v750_v1  ;;  %v202_v4 = vld [vmem:[%s166_s28] sm:$0xff]  ;;  %v611_v5 = vpack.c.bf16 %v205_v3, %v203_v2  ;;  %v204_v6 = vld [vmem:[%s166_s28 + $0x10] sm:$0xff]  ;;  %v207_v7 = vld [vmem:[%s166_s28 + $0x28] sm:$0xff]  ;;  %vm211_vm0 = vcmask 261120   ;;  %p193_p7 = scmp.lt.s32.totalorder %s791_s16, 3  ;;  %v751_v17 = vmov 0  }
  0x33   : > { %620 = vmatpush3.bf16.msra.mxu1 %v750_v1  ;;  %v209_v8 = vld [vmem:[%s166_s28 + $0x38] sm:$0xff]  ;;  %v613_v9 = vpack.c.bf16 %v204_v6, %v202_v4  ;;  %v206_v11 = vld [vmem:[%s166_s28 + $0x20] sm:$0xff]  ;;  %v208_v12 = vld [vmem:[%s166_s28 + $0x30] sm:$0xff]  ;;  %679 = vset.pattern.permute.xlu0 %v751_v17  ;;  %v430_v19 = vshrl.u32 %v429_v18, 7  ;;  %v432_v20 = vand.u32 127, %v429_v18  ;;  %vm437_vm2 = vcmask 64512  }
  0x34   : > { %621 = vmatprep.subr.bf16.mxu1 %v750_v1  ;;  %v615_v10 = vpack.c.bf16 %v209_v8, %v207_v7  ;;  %612 = vmatprep.subr.bf16.mxu0 %v611_v5  ;;  %v617_v13 = vpack.c.bf16 %v208_v12, %v206_v11  ;;  %v210_v14 = vld [vmem:[%s891_s1] sm:$0xff]  ;;  %s902_s16 = smov (!%p193_p7, %s791_s16), 3  ;;  %vm457_vm3 = vcmask 1040384   ;;  %vm459_vm4 = vcmask 58368  }
  0x35   : > { %614 = vmatpush1.bf16.msra.mxu0 %v613_v9  ;;  %s575_s27 = sshll.u32 %s902_s16, 4  ;;  %v448_v21 = vsub.s32 %v432_v20, %v430_v19  ;;  %vm433_vm1 = vcmp.eq.s32.totalorder %v430_v19, %v432_v20  ;;  %s569_s5 = sshll.u32 %s902_s16, 1 }
  0x36   : > { %616 = vmatprep.subr.bf16.mxu0 %v615_v10  ;;  %s197_s4 = scalar_lea.vmem %s892_s2, %s575_s27  ;;  %v571_v25 = vsel %vm433_vm1, 1.0, %v749_v0  ;;  %s201_s8 = scalar_lea.vmem %s893_s3, %s569_s5 }
  0x37   : > { %622 = vmatpush3.bf16.msra.mxu1 %v750_v1 }
  0x38   : > { %623 = vmatprep.subr.bf16.mxu1 %v750_v1 }
  0x39   : > { %618 = vmatpush1.bf16.msra.mxu0 %v617_v13 }
  0x3b   : > { %624 = vmatpush3.bf16.msra.mxu1 %v750_v1 }
  0x3c   : > { %625 = vmatprep.subr.bf16.mxu1 %v750_v1  ;;  %570 = vmatmul.mubr.msk.f32.vlgmr.msra.gmra.mrb[0].mxu0 %vm211_vm0, %v210_v14 }
  0x3f   : > { %626 = vmatpush3.bf16.msra.mxu1 %v750_v1 }
  0x40   : > { %627 = vmatprep.subr.bf16.mxu1 %v750_v1 }
  0x43   : > { %628 = vmatpush3.bf16.msra.mxu1 %v750_v1 }
  0x44   : > { %629 = vmatprep.subr.bf16.mxu1 %v750_v1 }
  0x47   : > { %630 = vmatpush3.bf16.msra.mxu1 %v750_v1 }
  0x48   : > { %631 = vmatprep.subr.bf16.mxu1 %v750_v1 }
  0x4b   : > { %632 = vmatpush3.bf16.msra.mxu1 %v750_v1 }
  0x4c   : > { %633 = vmatprep.subr.bf16.mxu1 %v750_v1 }
  0x4f   : > { %634 = vmatpush3.bf16.msra.mxu1 %v750_v1 }
 0x10f   : > { %v281_v15 = vpop.f32.mrb[0].mxu0 }
 0x110   : > { %286 = vst [vmem:[%s197_s4] sm:$0xff] %v281_v15  ;;  %v283_v16 = vpop.f32.mrb[1].mxu0 }
 0x111   : > { %287 = vst [vmem:[%s197_s4 + $0x8] sm:$0xff] %v283_v16  ;;  %352 = vmatprep.mubr.f32.mxu1 %v283_v16  ;;  %359 = vmatprep.subr.mxu0 %v283_v16 }
 0x112   : > { %423 = vmatprep.mubr.f32.mxu0 %v283_v16  ;;  %353 = vmatmul.mubr.f32.vlgmr.msra.gmra.mrb[0].mxu1 %v281_v15 }
 0x113   : > { %360 = vmatpush1.xpose.msra.mxu0 %v281_v15 }
 0x116   : > { %424 = vmatmul.mubr.f32.vlgmr.msra.gmra.mrb[2].mxu0 %v281_v15 }
 0x1e5   : > { %v608_v22 = vpop.f32.mrb[0].mxu1 }
 0x1e6   : > { %v609_v23 = vpop.f32.mrb[1].mxu1 }
 0x1e7   : > { %v610_v24 = vadd.f32 %v609_v23, %v608_v22 }
 0x1e9   : > { %v425_v26 = vpop.f32.mrb[2].mxu0 }
 0x1ea   : > { %v436_v27 = vmul.f32 %v571_v25, %v425_v26  ;;  %v427_v28 = vpop.f32.mrb[3].mxu0 }
 0x1ec   : > { %v438_v29 = vsel %vm437_vm2, %v436_v27, 0.0 }
 0x1ed   : > { %439 = vadd.xlane.f32.xlu0 %v438_v29 }
 0x203   : > { %444 = vperm.xlu0 %679, %v610_v24  }
 0x27a   : > { %v440_v30 = vpop.xlane.xlu0 %439 }
 0x27b   : > { %v455_v32 = vrot.slane %v440_v30, %v448_v21 }
 0x282   : > { %v445_v31 = vpop.permute.xlu0 %444 }
 0x283   : > { %v449_v33 = vrot.slane %v445_v31, %v448_v21 }
 0x285   : > { %v458_v34 = vsel %vm457_vm3, %v449_v33, %v455_v32 }
 0x286   : > { %460 = vst.msk [vmem:[%s201_s8] sm:$0x3] %vm459_vm4, %v458_v34 }
 0x287 PF: > { %p14_p8 = scmp.ge.s32.totalorder %s794_s17, 6   ;;  %s897_s12 = smov %s736_s13 }
 0x288   : > { %s898_s13 = smov %s740_s14  ;;  %s899_s14 = smov %s804_s20 }
 0x289   : > { %s900_s15 = smov %s794_s17  ;;  %16 = sbr.rel (!%p14_p8) target bundleno = 3 (0x3), region = 80 }
 0x290   :  { %496 = vsyncpa [#allocation3], 1 }
 0x291   :  { %498 = vsyncpa [#allocation3 + $0x1], 1 }

// kernel: bottleneck_forward.5
= control target key start
LH: loop header
LB: loop body
LE: loop exit
PB: predicated region body
PF: predicated region fallthrough
CT: control target
= control target key end

     0   :  { %s916_s18 = smov 0   ;;  %s967_s0 = inlined_call_operand.vmem [shape: f32[4,8,256], index: 0, kind: input, shape index: {}]   ;;  %s968_s1 = inlined_call_operand.vmem [shape: f32[1,8,1], index: 1, kind: input, shape index: {}]   ;;  %s969_s2 = inlined_call_operand.vmem [shape: f32[1,8,1], index: 2, kind: input, shape index: {}]   ;;  %s970_s3 = inlined_call_operand.vmem [shape: f32[3,8,8], index: 3, kind: input, shape index: {}]   ;;  %s971_s4 = inlined_call_operand.vmem [shape: f32[4,8,256], index: 4, kind: output, shape index: {0}]   ;;  %s972_s5 = inlined_call_operand.vmem [shape: f32[4,2,8], index: 5, kind: output, shape index: {1}]  }
   0x1 LB: > { %s777_s19 = sadd.s32 4294967295, %s879_s18   ;;  %p781_p0 = scmp.ge.s32.totalorder %s879_s18, 1  ;;  %s879_s18 = sphi %s916_s18, %s16_s18  }
   0x2   : > { %p190_p1 = scmp.lt.s32.totalorder %s879_s18, 5 }
   0x4   : > { %p191_p2 = pnand %p781_p0, %p190_p1 }
   0x5   : > { %v238_v0 = vld [vmem:[%s968_s1] sm:$0xff] (!%p191_p2)  ;;  %v881_v1 = vmov (!%p191_p2), 0   ;;  %v882_v3 = vmov (!%p191_p2), 0.0   ;;  %p222_p3 = scmp.lt.s32.totalorder (!%p191_p2), %s777_s19, 3  ;;  %v787_v14 = vld [vmem:[%s970_s3 + $0x8] sm:$0xff] (!%p191_p2)  ;;  %vm292_vm0 = vcmask (!%p191_p2), 64512   ;;  %v256_v16 = vlaneseq (!%p191_p2) }
   0x6   : > { %194 = sbr.rel (%p191_p2) target bundleno = 853 (0x355), region = 36  ;;  %871 = vset.pattern.permute.xlu0 (!%p191_p2), %v881_v1  ;;  %872 = vset.pattern.permute.xlu1 (!%p191_p2), %v881_v1  ;;  %v246_v2 = vld [vmem:[%s969_s2] sm:$0xff] (!%p191_p2)  ;;  %s883_s30 = smov (!%p191_p2), 127   ;;  %v885_v15 = vmov (!%p191_p2), 1.0|1.0   ;;  %v792_v28 = vld [vmem:[%s970_s3 + $0x10] sm:$0xff] (!%p191_p2) }
   0x7   : > { %241 = vperm.xlu0 (!%p191_p2), %871, %v238_v0   ;;  %360 = vmatprep.mubr.f32.mxu0 (!%p191_p2), %v882_v3  ;;  %s884_s6 = smov (!%p191_p2), 1   ;;  %v257_v17 = vand.u32 (!%p191_p2), 127, %v256_v16  ;;  %v289_v23 = vld [vmem:[%s970_s3] sm:$0xff] (!%p191_p2)  ;;  %v663_v31 = vshrl.u32 (!%p191_p2), %v256_v16, 7  ;;  %vm687_vm6 = vcmask (!%p191_p2), 1040384   ;;  %vm689_vm7 = vcmask (!%p191_p2), 58368  }
   0x8   : > { %838 = vmatprep.subr.bf16.mxu1 (!%p191_p2), %v885_v15 }
   0x9   : > { %839 = vmatpush3.bf16.msra.mxu1 (!%p191_p2), %v885_v15  ;;  %vm265_vm1 = vcmp.lt.s32.totalorder (!%p191_p2), %v257_v17, 1  ;;  %v258_v19 = vadd.s32 (!%p191_p2), 128, %v257_v17  ;;  %vm801_vm2 = vcmp.ne.s32.totalorder (!%p191_p2), %v257_v17, 0  ;;  %vm280_vm3 = vcmp.lt.s32.totalorder (!%p191_p2), %v257_v17, 127 }
   0xa   : > { %840 = vmatprep.subr.bf16.mxu1 (!%p191_p2), %v885_v15  ;;  %vm664_vm5 = vcmp.eq.s32.totalorder (!%p191_p2), %v663_v31, %v257_v17  ;;  %v678_v40 = vsub.s32 (!%p191_p2), %v257_v17, %v663_v31 }
   0xb   : > { %249 = vperm.xlu0 (!%p191_p2), %871, %v246_v2   ;;  %vm802_vm4 = vcmp.ne.s32.totalorder (!%p191_p2), %v258_v19, 255  ;;  %v796_v35 = vsel (!%p191_p2), %vm664_vm5, 1.0, %v882_v3 }
   0xd   : > { %s974_s19 = smov (!%p222_p3, %s777_s19), 3  ;;  %841 = vmatpush3.bf16.msra.mxu1 %v885_v15 }
   0xe   : > { %s799_s24 = sshll.u32 %s974_s19, 4  ;;  %842 = vmatprep.subr.bf16.mxu1 %v885_v15  ;;  %s786_s14 = sshll.u32 %s974_s19, 1 }
   0xf   : > { %s226_s27 = scalar_lea.vmem %s967_s0, %s799_s24  ;;  %s231_s13 = scalar_lea.vmem %s971_s4, %s799_s24 }
  0x10   : > { %v236_v5 = vld [vmem:[%s226_s27] sm:$0xff]  ;;  %v237_v6 = vld [vmem:[%s226_s27 + $0x8] sm:$0xff]  ;;  %s235_s17 = scalar_lea.vmem %s972_s5, %s786_s14 }
  0x11   : > { %843 = vmatpush3.bf16.msra.mxu1 %v885_v15 }
  0x12   : > { %844 = vmatprep.subr.bf16.mxu1 %v885_v15 }
  0x15   : > { %845 = vmatpush3.bf16.msra.mxu1 %v885_v15 }
  0x16   : > { %846 = vmatprep.subr.bf16.mxu1 %v885_v15 }
  0x19   : > { %847 = vmatpush3.bf16.msra.mxu1 %v885_v15 }
  0x1a   : > { %848 = vmatprep.subr.bf16.mxu1 %v885_v15 }
  0x1d   : > { %849 = vmatpush3.bf16.msra.mxu1 %v885_v15 }
  0x1e   : > { %850 = vmatprep.subr.bf16.mxu1 %v885_v15 }
  0x21   : > { %851 = vmatpush3.bf16.msra.mxu1 %v885_v15 }
  0x22   : > { %852 = vmatprep.subr.bf16.mxu1 %v885_v15 }
  0x25   : > { %853 = vmatpush3.bf16.msra.mxu1 %v885_v15 }
  0x86   : > { %v242_v4 = vpop.permute.xlu0 %241 }
  0x87   : > { %v244_v7 = vmul.f32 %v242_v4, %v236_v5  ;;  %v245_v8 = vmul.f32 %v242_v4, %v237_v6 }
  0x8a   : > { %v250_v9 = vpop.permute.xlu0 %249 }
  0x8b   : > { %v252_v10 = vadd.f32 %v250_v9, %v244_v7  ;;  %v253_v11 = vadd.f32 %v250_v9, %v245_v8 }
  0x8d   : > { %v254_v12 = vmax.f32 %v252_v10, 0.0  ;;  %v255_v13 = vmax.f32 %v253_v11, 0.0 }
  0x8f   : > { %296 = vmatprep.subr.mxu0 %v255_v13  ;;  %276 = vrot.lane.b32.xlu0 %v254_v12, %s883_s30 }
  0x90   : > { %261 = vrot.lane.b32.xlu1 %v254_v12, %s884_s6  ;;  %297 = vmatpush1.msra.mxu0 %v254_v12 }
  0x91   : > { %788 = vmatmul.mubr.msk.f32.vlgmr.msra.gmra.mrb[0].mxu0 %vm292_vm0, %v787_v14 }
  0x92   : > { %434 = vmatprep.mubr.f32.mxu0 %v882_v3 }
  0x94   : > { %263 = vrot.lane.b32.xlu1 %v255_v13, %s884_s6 }
  0x98   : > { %278 = vrot.lane.b32.xlu1 %v255_v13, %s883_s30 }
 0x101   : > { %v277_v24 = vpop.permute.xlu0 %276 }
 0x102   : > { %v262_v18 = vpop.permute.xlu1 %261 }
 0x106   : > { %v264_v20 = vpop.permute.xlu1 %263 }
 0x107   : > { %v267_v21 = vsel %vm265_vm1, %v264_v20, %v262_v18  ;;  %v266_v22 = vsel %vm265_vm1, %v262_v18, %v264_v20 }
 0x108   : > { %370 = vmatprep.subr.mxu0 %v266_v22 }
 0x109   : > { %790 = vmatpush1.msk.msra.mxu0 %vm801_vm2, %v267_v21 }
 0x10a   : > { %v279_v25 = vpop.permute.xlu1 %278  ;;  %791 = vmatmul.mubr.msk.f32.vlgmr.msra.gmra.mrb[0].mxu0 %vm292_vm0, %v289_v23 }
 0x10b   : > { %v281_v26 = vsel %vm280_vm3, %v277_v24, %v279_v25  ;;  %v282_v27 = vsel %vm280_vm3, %v279_v25, %v277_v24  ;;  %510 = vmatprep.mubr.f32.mxu0 %v882_v3 }
 0x10c   : > { %794 = vmatprep.subr.msk.mxu0 %vm802_vm4, %v282_v27 }
 0x10d   : > { %447 = vmatpush1.msra.mxu0 %v281_v26 }
 0x112   : > { %795 = vmatmul.mubr.msk.f32.vlgmr.msra.gmra.mrb[0].mxu0 %vm292_vm0, %v792_v28 }
 0x1e5   : > { %v512_v29 = vpop.f32.mrb[0].mxu0 }
 0x1e6   : > { %519 = vst [vmem:[%s231_s13] sm:$0xff] %v512_v29  ;;  %v514_v30 = vpop.f32.mrb[1].mxu0 }
 0x1e7   : > { %520 = vst [vmem:[%s231_s13 + $0x8] sm:$0xff] %v514_v30  ;;  %585 = vmatprep.mubr.f32.mxu1 %v514_v30  ;;  %592 = vmatprep.subr.mxu0 %v514_v30 }
 0x1e8   : > { %656 = vmatprep.mubr.f32.mxu0 %v514_v30  ;;  %586 = vmatmul.mubr.f32.vlgmr.msra.gmra.mrb[0].mxu1 %v512_v29 }
 0x1e9   : > { %593 = vmatpush1.xpose.msra.mxu0 %v512_v29 }
 0x1ec   : > { %657 = vmatmul.mubr.f32.vlgmr.msra.gmra.mrb[2].mxu0 %v512_v29 }
 0x2bb   : > { %v835_v32 = vpop.f32.mrb[0].mxu1 }
 0x2bc   : > { %v836_v33 = vpop.f32.mrb[1].mxu1 }
 0x2bd   : > { %v837_v34 = vadd.f32 %v836_v33, %v835_v32 }
 0x2bf   : > { %v658_v36 = vpop.f32.mrb[2].mxu0  ;;  %674 = vperm.xlu1 %872, %v837_v34  }
 0x2c0   : > { %v667_v37 = vmul.f32 %v796_v35, %v658_v36  ;;  %v660_v38 = vpop.f32.mrb[3].mxu0 }
 0x2c2   : > { %v668_v39 = vsel %vm292_vm0, %v667_v37, 0.0 }
 0x2c3   : > { %669 = vadd.xlane.f32.xlu0 %v668_v39 }
 0x33e   : > { %v675_v41 = vpop.permute.xlu1 %674 }
 0x33f   : > { %v679_v43 = vrot.slane %v675_v41, %v678_v40 }
 0x350   : > { %v670_v42 = vpop.xlane.xlu0 %669 }
 0x351   : > { %v685_v44 = vrot.slane %v670_v42, %v678_v40 }
 0x353   : > { %v688_v45 = vsel %vm687_vm6, %v679_v43, %v685_v44 }
 0x354   : > { %690 = vst.msk [vmem:[%s235_s17] sm:$0x3] %vm689_vm7, %v688_v45 }
 0x355 PF: > { %s16_s18 = sadd.s32 1, %s879_s18  }
 0x356   : > { %p13_p4 = scmp.ge.s32.totalorder %s16_s18, 6  }
 0x358   :  { %15 = sbr.rel (!%p13_p4) target bundleno = 1 (0x1), region = 80 }

// kernel: bottleneck_forward.6
= control target key start
LH: loop header
LB: loop body
LE: loop exit
PB: predicated region body
PF: predicated region fallthrough
CT: control target
= control target key end

     0   :  { %s568_s15 = smov 0   ;;  %s603_s0 = inlined_call_operand.vmem [shape: f32[4,8,256], index: 0, kind: input, shape index: {}]   ;;  %s604_s1 = inlined_call_operand.vmem [shape: f32[1,8,1], index: 1, kind: input, shape index: {}]   ;;  %s605_s2 = inlined_call_operand.vmem [shape: f32[1,8,1], index: 2, kind: input, shape index: {}]   ;;  %s606_s3 = inlined_call_operand.vmem [shape: f32[4,1,8], index: 3, kind: output, shape index: {0}]   ;;  %s607_s4 = inlined_call_operand.vmem [shape: f32[4,8,8], index: 4, kind: output, shape index: {1}]  }
   0x1 LB: > { %s459_s16 = sadd.s32 4294967295, %s539_s15   ;;  %p463_p0 = scmp.ge.s32.totalorder %s539_s15, 1  ;;  %s539_s15 = sphi %s568_s15, %s15_s15  }
   0x2   : > { %p165_p1 = scmp.lt.s32.totalorder %s539_s15, 5 }
   0x4   : > { %p166_p2 = pnand %p463_p0, %p165_p1 }
   0x5   : > { %v207_v0 = vld [vmem:[%s604_s1] sm:$0xff] (!%p166_p2)  ;;  %v541_v1 = vmov (!%p166_p2), 0   ;;  %v542_v2 = vmov (!%p166_p2), 1.0|1.0   ;;  %p193_p3 = scmp.lt.s32.totalorder (!%p166_p2), %s459_s16, 3  ;;  %vm379_vm0 = vcmask (!%p166_p2), 64512   ;;  %v300_v19 = vlaneseq (!%p166_p2) }
   0x6   : > { %169 = sbr.rel (%p166_p2) target bundleno = 490 (0x1ea), region = 32  ;;  %531 = vset.pattern.permute.xlu0 (!%p166_p2), %v541_v1  ;;  %505 = vmatprep.subr.bf16.mxu0 (!%p166_p2), %v542_v2  ;;  %v215_v3 = vld [vmem:[%s605_s2] sm:$0xff] (!%p166_p2)  ;;  %vm307_vm1 = vcmask (!%p166_p2), 57344  }
   0x7   : > { %210 = vperm.xlu0 (!%p166_p2), %531, %v207_v0   ;;  %506 = vmatpush3.bf16.msra.mxu0 (!%p166_p2), %v542_v2  ;;  %v301_v20 = vand.u32 (!%p166_p2), 127, %v300_v19  ;;  %v303_v21 = vshrl.u32 (!%p166_p2), %v300_v19, 7 }
   0x8   : > { %507 = vmatprep.subr.bf16.mxu0 (!%p166_p2), %v542_v2  ;;  %532 = vset.pattern.permute.xlu1 (!%p166_p2), %v541_v1 }
   0x9   : > { %v304_v22 = vsub.s32 (!%p166_p2), %v301_v20, %v303_v21 }
   0xb   : > { %218 = vperm.xlu0 (!%p166_p2), %531, %v215_v3   ;;  %508 = vmatpush3.bf16.msra.mxu0 (!%p166_p2), %v542_v2 }
   0xc   : > { %509 = vmatprep.subr.bf16.mxu0 (!%p166_p2), %v542_v2 }
   0xd   : > { %s609_s16 = smov (!%p193_p3, %s459_s16), 3 }
   0xe   : > { %s469_s21 = sshll.u32 %s609_s16, 4  ;;  %s466_s25 = sshll.u32 %s609_s16, 3 }
   0xf   : > { %510 = vmatpush3.bf16.msra.mxu0 %v542_v2  ;;  %s197_s24 = scalar_lea.vmem %s603_s0, %s469_s21  ;;  %s204_s28 = scalar_lea.vmem %s607_s4, %s466_s25 }
  0x10   : > { %511 = vmatprep.subr.bf16.mxu0 %v542_v2  ;;  %v205_v5 = vld [vmem:[%s197_s24] sm:$0xff]  ;;  %v206_v6 = vld [vmem:[%s197_s24 + $0x8] sm:$0xff]  ;;  %s200_s5 = scalar_lea.vmem %s606_s3, %s609_s16 }
  0x13   : > { %512 = vmatpush3.bf16.msra.mxu0 %v542_v2 }
  0x14   : > { %513 = vmatprep.subr.bf16.mxu0 %v542_v2 }
  0x17   : > { %514 = vmatpush3.bf16.msra.mxu0 %v542_v2 }
  0x18   : > { %515 = vmatprep.subr.bf16.mxu0 %v542_v2 }
  0x1b   : > { %516 = vmatpush3.bf16.msra.mxu0 %v542_v2 }
  0x1c   : > { %517 = vmatprep.subr.bf16.mxu0 %v542_v2 }
  0x1f   : > { %518 = vmatpush3.bf16.msra.mxu0 %v542_v2 }
  0x20   : > { %519 = vmatprep.subr.bf16.mxu0 %v542_v2 }
  0x23   : > { %520 = vmatpush3.bf16.msra.mxu0 %v542_v2 }
  0x86   : > { %v211_v4 = vpop.permute.xlu0 %210 }
  0x87   : > { %v213_v7 = vmul.f32 %v211_v4, %v205_v5  ;;  %v214_v8 = vmul.f32 %v211_v4, %v206_v6 }
  0x8a   : > { %v219_v9 = vpop.permute.xlu0 %218 }
  0x8b   : > { %v221_v10 = vadd.f32 %v219_v9, %v213_v7  ;;  %v222_v11 = vadd.f32 %v219_v9, %v214_v8 }
  0x8d   : > { %v223_v12 = vmax.f32 %v221_v10, 0.0  ;;  %v224_v13 = vmax.f32 %v222_v11, 0.0 }
  0x8f   : > { %289 = vmatprep.mubr.f32.mxu0 %v224_v13  ;;  %309 = vmatprep.subr.mxu1 %v224_v13 }
  0x90   : > { %373 = vmatprep.mubr.f32.mxu1 %v224_v13  ;;  %290 = vmatmul.mubr.f32.vlgmr.msra.gmra.mrb[0].mxu0 %v223_v12 }
  0x91   : > { %310 = vmatpush1.xpose.msra.mxu1 %v223_v12 }
  0x94   : > { %374 = vmatmul.mubr.f32.vlgmr.msra.gmra.mrb[0].mxu1 %v223_v12 }
 0x163   : > { %v502_v14 = vpop.f32.mrb[0].mxu0 }
 0x164   : > { %v503_v15 = vpop.f32.mrb[1].mxu0 }
 0x165   : > { %v504_v16 = vadd.f32 %v503_v15, %v502_v14 }
 0x167   : > { %v375_v17 = vpop.f32.mrb[0].mxu1  ;;  %298 = vperm.xlu1 %532, %v504_v16  }
 0x168   : > { %380 = vst.msk [vmem:[%s204_s28] sm:$0xff] %vm379_vm0, %v375_v17  ;;  %v377_v18 = vpop.f32.mrb[1].mxu1 }
 0x1e6   : > { %v299_v23 = vpop.permute.xlu1 %298 }
 0x1e7   : > { %v305_v24 = vrot.slane %v299_v23, %v304_v22 }
 0x1e9   : > { %308 = vst.msk [vmem:[%s200_s5] sm:$0x1] %vm307_vm1, %v305_v24 }
 0x1ea PF: > { %s15_s15 = sadd.s32 1, %s539_s15  }
 0x1eb   : > { %p12_p4 = scmp.ge.s32.totalorder %s15_s15, 6  }
 0x1ed   :  { %14 = sbr.rel (!%p12_p4) target bundleno = 1 (0x1), region = 74 }

// kernel: bottleneck_forward.7
= control target key start
LH: loop header
LB: loop body
LE: loop exit
PB: predicated region body
PF: predicated region fallthrough
CT: control target
= control target key end

     0   :  { %12 = vsyncpa [#allocation3], 0  ;;  %s953_s0 = inlined_call_operand.vmem [shape: f32[4,8,256], index: 0, kind: input, shape index: {}]   ;;  %s954_s1 = inlined_call_operand.vmem [shape: f32[4,32,256], index: 1, kind: input, shape index: {}]   ;;  %s955_s2 = inlined_call_operand.vmem [shape: f32[1,8,1], index: 2, kind: input, shape index: {}]   ;;  %s956_s3 = inlined_call_operand.vmem [shape: f32[1,8,1], index: 3, kind: input, shape index: {}]   ;;  %s957_s4 = inlined_call_operand.vmem [shape: f32[32,8], index: 4, kind: input, shape index: {}]   ;;  %s958_s5 = inlined_call_operand.vmem [shape: f32[1,32,1], index: 5, kind: input, shape index: {}]   ;;  %s959_s6 = inlined_call_operand.vmem [shape: f32[1,32,1], index: 6, kind: input, shape index: {}]   ;;  %s960_s7 = inlined_call_operand.hbm [shape: f32[4,32,256], index: 7, kind: output, shape index: {}]  }
   0x1   :  { %14 = vsyncpa [#allocation3 + $0x1], 0  ;;  %s784_s24 = smov 0   ;;  %s786_s25 = smov 0  }
   0x2   :  { %s788_s26 = smov 0   ;;  %s790_s27 = smov 0  }
   0x3 LB: > { %s805_s28 = sadd.s32 4294967295, %s737_s27   ;;  %s607_s29 = sadd.s32 4294967294, %s737_s27   ;;  %s737_s27 = sphi %s790_s27, %s966_s27   ;;  %s733_s26 = sphi %s788_s26, %s965_s26   ;;  %s729_s25 = sphi %s786_s25, %s964_s25   ;;  %s725_s24 = sphi %s784_s24, %s963_s24  }
   0x4   : > { %s809_s30 = sadd.s32 1, %s737_s27   ;;  %s184_s8 = sadd.s32 1, %s733_s26 }
   0x5   : > { %s181_s9 = ssub.s32 %s737_s27, %s809_s30  ;;  %p194_p0 = scmp.ne.s32.totalorder %s733_s26, %s729_s25 }
   0x6   : > { %p182_p1 = scmp.eq.s32.totalorder %s181_s9, 0  ;;  %p195_p2 = scmp.eq.s32.totalorder %s805_s28, 3 }
   0x7   : > { %p200_p3 = scmp.ne.s32.totalorder %s729_s25, %s725_s24  ;;  %p201_p4 = scmp.eq.s32.totalorder %s607_s29, 3 }
   0x8   : > { %s820_s10 = scalar_select %p182_p1, %s733_s26, %s184_s8  }
   0x9   : > { %p822_p5 = por %p195_p2, %p194_p0  ;;  %p826_p6 = por %p201_p4, %p200_p3 }
   0xa   : > { %p610_p7 = scmp.ge.s32.totalorder %s737_s27, 1  ;;  %p250_p8 = scmp.lt.s32.totalorder %s737_s27, 5 }
   0xc   : > { %p251_p9 = pnand %p610_p7, %p250_p8 }
   0xd   : > { %v299_v0 = vld [vmem:[%s955_s2] sm:$0xff] (!%p251_p9)  ;;  %v739_v1 = vmov (!%p251_p9), 0   ;;  %v425_v3 = vld [vmem:[%s958_s5 + $0x10] sm:$0xff] (!%p251_p9)  ;;  %v740_v5 = vmov (!%p251_p9), 0.0   ;;  %v424_v8 = vld [vmem:[%s958_s5 + $0x8] sm:$0xff] (!%p251_p9)  ;;  %p287_p10 = scmp.lt.s32.totalorder (!%p251_p9), %s805_s28, 3 }
   0xe   : > { %254 = sbr.rel (%p251_p9) target bundleno = 393 (0x189), region = 48  ;;  %673 = vset.pattern.permute.xlu0 (!%p251_p9), %v739_v1  ;;  %674 = vset.pattern.permute.xlu1 (!%p251_p9), %v739_v1  ;;  %v307_v2 = vld [vmem:[%s956_s3] sm:$0xff] (!%p251_p9)  ;;  %v457_v6 = vld [vmem:[%s959_s6 + $0x10] sm:$0xff] (!%p251_p9)  ;;  %v426_v9 = vld [vmem:[%s958_s5 + $0x18] sm:$0xff] (!%p251_p9)  ;;  %vm321_vm0 = vcmask (!%p251_p9), 64512   ;;  %s627_s29 = sshll.u32 (!%p251_p9), %s805_s28, 10 }
   0xf   : > { %302 = vperm.xlu0 (!%p251_p9), %673, %v299_v0   ;;  %v455_v4 = vld [vmem:[%s959_s6] sm:$0xff] (!%p251_p9)  ;;  %398 = vmatprep.mubr.f32.mxu0 (!%p251_p9), %v740_v5  ;;  %v456_v10 = vld [vmem:[%s959_s6 + $0x8] sm:$0xff] (!%p251_p9)  ;;  %v458_v11 = vld [vmem:[%s959_s6 + $0x18] sm:$0xff] (!%p251_p9)  ;;  %s906_s15 = scalar_lea.hbm (!%p251_p9), %s960_s7, %s627_s29  ;;  %s741_s17 = smov (!%p251_p9), [#allocation2]  }
  0x10   : > { %410 = vmatprep.mubr.f32.mxu1 (!%p251_p9), %v740_v5  ;;  %v423_v7 = vld [vmem:[%s958_s5] sm:$0xff] (!%p251_p9)  ;;  %v319_v23 = vld [vmem:[%s957_s4 + $0x10] sm:$0xff] (!%p251_p9)  ;;  %v318_v24 = vld [vmem:[%s957_s4 + $0x8] sm:$0xff] (!%p251_p9) }
  0x11   : > { %429 = vperm.xlu1 (!%p251_p9), %674, %v423_v7   ;;  %v317_v22 = vld [vmem:[%s957_s4] sm:$0xff] (!%p251_p9)  ;;  %v320_v25 = vld [vmem:[%s957_s4 + $0x18] sm:$0xff] (!%p251_p9) }
  0x13   : > { %310 = vperm.xlu0 (!%p251_p9), %673, %v307_v2  }
  0x15   : > { %434 = vperm.xlu1 %674, %v424_v8   ;;  %s864_s19 = scalar_select %p287_p10, %s805_s28, 3 }
  0x17   : > { %439 = vperm.xlu0 %673, %v425_v3   ;;  %s625_s20 = sshll.u32 %s864_s19, 4  ;;  %s626_s18 = sshll.u32 %s864_s19, 6 }
  0x18   : > { %s291_s23 = scalar_lea.vmem %s953_s0, %s625_s20  ;;  %s886_s22 = scalar_lea.vmem %s954_s1, %s626_s18 }
  0x19   : > { %444 = vperm.xlu1 %674, %v426_v9   ;;  %v297_v13 = vld [vmem:[%s291_s23] sm:$0xff]  ;;  %v298_v14 = vld [vmem:[%s291_s23 + $0x8] sm:$0xff]  ;;  %s284_s23 = sand.u32 1, %s729_s25   ;;  %v489_v60 = vld [vmem:[%s886_s22 + $0x10] sm:$0xff]  ;;  %s679_s18 = sshll.u32 %s741_s17, 4  ;;  %s680_s18 = int_to_ptr.vmem [resolvable:$false] %s679_s18 }
  0x1a   : > { %v487_v39 = vld [vmem:[%s886_s22] sm:$0xff]  ;;  %s893_s19 = sshll.u32 %s284_s23, 6  ;;  %v488_v45 = vld [vmem:[%s886_s22 + $0x8] sm:$0xff]  ;;  %v493_v61 = vld [vmem:[%s886_s22 + $0x30] sm:$0xff]  ;;  %s912_s28 = scalar_lea.sflag [#allocation3], %s284_s23 }
  0x1b   : > { %461 = vperm.xlu0 %673, %v455_v4   ;;  %v491_v40 = vld [vmem:[%s886_s22 + $0x20] sm:$0xff]  ;;  %v492_v46 = vld [vmem:[%s886_s22 + $0x28] sm:$0xff]  ;;  %v490_v4 = vld [vmem:[%s886_s22 + $0x18] sm:$0xff]  ;;  %s286_s8 = scalar_lea.vmem [#allocation2], %s893_s19  ;;  %s681_s20 = scalar_lea.vmem %s680_s18, 2048 }
  0x1c   : > { %s533_s9 = sshll.u32 %s286_s8, 4  ;;  %s908_s9 = int_to_ptr.vmem [resolvable:$true] %s533_s9 }
  0x1d   : > { %466 = vperm.xlu1 %674, %v456_v10   ;;  %s675_s16 = scalar_lea.vmem %s908_s9, 1024  ;;  %p682_p0 = scmp.lt.s32.totalorder %s908_s9, %s680_s18 }
  0x1e   : > { %p676_p11 = scmp.ne.s32.totalorder %s908_s9, %s675_s16  ;;  %p683_p1 = scmp.lt.s32.totalorder %s681_s20, %s675_s16 }
  0x1f   : > { %471 = vperm.xlu0 %673, %v457_v6  }
  0x20   : > { %p677_p12 = pnand %p676_p11, %p822_p5  ;;  %p684_p2 = por %p683_p1, %p682_p0 }
  0x21   : > { %476 = vperm.xlu1 %674, %v458_v11  }
  0x22   : > { %p678_p13 = pneg %p677_p12 }
  0x24   : > { %p685_p3 = pnand %p684_p2, %p678_p13 }
  0x8e   : > { %v303_v12 = vpop.permute.xlu0 %302 }
  0x8f   : > { %v305_v15 = vmul.f32 %v303_v12, %v297_v13  ;;  %v306_v16 = vmul.f32 %v303_v12, %v298_v14 }
  0x90   : > { %v430_v26 = vpop.permute.xlu1 %429 }
  0x92   : > { %v311_v17 = vpop.permute.xlu0 %310 }
  0x93   : > { %v313_v18 = vadd.f32 %v311_v17, %v305_v15  ;;  %v314_v19 = vadd.f32 %v311_v17, %v306_v16 }
  0x94   : > { %v435_v27 = vpop.permute.xlu1 %434 }
  0x95   : > { %v316_v20 = vmax.f32 %v314_v19, 0.0  ;;  %v315_v21 = vmax.f32 %v313_v18, 0.0 }
  0x96   : > { %v440_v28 = vpop.permute.xlu0 %439 }
  0x97   : > { %334 = vmatprep.subr.mxu0 %v316_v20  ;;  %628 = vmatprep.subr.mxu1 %v316_v20 }
  0x98   : > { %335 = vmatpush1.msra.mxu0 %v315_v21  ;;  %629 = vmatpush1.msra.mxu1 %v315_v21  ;;  %v445_v29 = vpop.permute.xlu1 %444 }
  0x99   : > { %616 = vmatmul.mubr.msk.f32.vlgmr.msra.gmra.mrb[0].mxu0 %vm321_vm0, %v317_v22  ;;  %618 = vmatmul.mubr.msk.f32.vlgmr.msra.gmra.mrb[0].mxu1 %vm321_vm0, %v319_v23 }
  0x9a   : > { %404 = vmatprep.mubr.f32.mxu0 %v740_v5  ;;  %416 = vmatprep.mubr.f32.mxu1 %v740_v5  ;;  %v462_v30 = vpop.permute.xlu0 %461  ;;  %v494_v5 = vld [vmem:[%s886_s22 + $0x38] sm:$0xff] }
  0x9c   : > { %v467_v31 = vpop.permute.xlu1 %466 }
  0x9d   : > { %617 = vmatmul.mubr.msk.f32.gmra.mrb[2].mxu0 %vm321_vm0, %v318_v24  ;;  %619 = vmatmul.mubr.msk.f32.gmra.mrb[2].mxu1 %vm321_vm0, %v320_v25 }
  0x9e   : > { %v472_v38 = vpop.permute.xlu0 %471 }
  0xa0   : > { %v477_v57 = vpop.permute.xlu1 %476 }
 0x16c   : > { %v400_v32 = vpop.f32.mrb[0].mxu0  ;;  %v412_v33 = vpop.f32.mrb[0].mxu1 }
 0x16d   : > { %v447_v34 = vmul.f32 %v430_v26, %v400_v32  ;;  %v451_v35 = vmul.f32 %v440_v28, %v412_v33  ;;  %v402_v36 = vpop.f32.mrb[1].mxu0  ;;  %v414_v37 = vpop.f32.mrb[1].mxu1 }
 0x16e   : > { %v448_v41 = vmul.f32 %v430_v26, %v402_v36  ;;  %v452_v42 = vmul.f32 %v440_v28, %v414_v37 }
 0x16f   : > { %v479_v43 = vadd.f32 %v462_v30, %v447_v34  ;;  %v483_v44 = vadd.f32 %v472_v38, %v451_v35 }
 0x170   : > { %v480_v47 = vadd.f32 %v462_v30, %v448_v41  ;;  %v484_v48 = vadd.f32 %v472_v38, %v452_v42  ;;  %v406_v49 = vpop.f32.mrb[2].mxu0  ;;  %v418_v50 = vpop.f32.mrb[2].mxu1 }
 0x171   : > { %v495_v51 = vadd.f32 %v487_v39, %v479_v43  ;;  %v499_v52 = vadd.f32 %v491_v40, %v483_v44  ;;  %v449_v53 = vmul.f32 %v435_v27, %v406_v49  ;;  %v453_v54 = vmul.f32 %v445_v29, %v418_v50  ;;  %v408_v55 = vpop.f32.mrb[3].mxu0  ;;  %v420_v56 = vpop.f32.mrb[3].mxu1 }
 0x172   : > { %v496_v58 = vadd.f32 %v488_v45, %v480_v47  ;;  %v500_v59 = vadd.f32 %v492_v46, %v484_v48  ;;  %v450_v62 = vmul.f32 %v435_v27, %v408_v55  ;;  %v454_v63 = vmul.f32 %v445_v29, %v420_v56 }
 0x173   : > { %v503_v0 = vmax.f32 %v495_v51, 0.0  ;;  %v507_v1 = vmax.f32 %v499_v52, 0.0  ;;  %v481_v2 = vadd.f32 %v467_v31, %v449_v53  ;;  %v485_v3 = vadd.f32 %v477_v57, %v453_v54 }
 0x174   : > { %v504_v6 = vmax.f32 %v496_v58, 0.0  ;;  %v508_v7 = vmax.f32 %v500_v59, 0.0  ;;  %v482_v8 = vadd.f32 %v467_v31, %v450_v62  ;;  %v486_v9 = vadd.f32 %v477_v57, %v454_v63 }
 0x175   : > { %511 = vst [vmem:[%s286_s8] sm:$0xff] %v503_v0  ;;  %515 = vst [vmem:[%s286_s8 + $0x20] sm:$0xff] %v507_v1  ;;  %v497_v10 = vadd.f32 %v489_v60, %v481_v2  ;;  %v501_v11 = vadd.f32 %v493_v61, %v485_v3 }
 0x176   : > { %512 = vst [vmem:[%s286_s8 + $0x8] sm:$0xff] %v504_v6  ;;  %516 = vst [vmem:[%s286_s8 + $0x28] sm:$0xff] %v508_v7  ;;  %v498_v12 = vadd.f32 %v490_v4, %v482_v8  ;;  %v502_v13 = vadd.f32 %v494_v5, %v486_v9 }
 0x177   : > { %v505_v14 = vmax.f32 %v497_v10, 0.0  ;;  %v509_v15 = vmax.f32 %v501_v11, 0.0 }
 0x178   : > { %v506_v16 = vmax.f32 %v498_v12, 0.0  ;;  %v510_v17 = vmax.f32 %v502_v13, 0.0 }
 0x179   : > { %513 = vst [vmem:[%s286_s8 + $0x10] sm:$0xff] %v505_v14  ;;  %517 = vst [vmem:[%s286_s8 + $0x30] sm:$0xff] %v509_v15 }
 0x17a   : > { %514 = vst [vmem:[%s286_s8 + $0x18] sm:$0xff] %v506_v16  ;;  %518 = vst [vmem:[%s286_s8 + $0x38] sm:$0xff] %v510_v17 }
 0x17b   : > { %688 = shalt.err (!%p685_p3)
}
 0x17c   : > { %s689_s21 = scalar_lea.hbm %s906_s15, 1024  ;;  %s693_s19 = scalar_lea.hbm %s960_s7, 4096 }
 0x17d   : > { %p690_p4 = scmp.ne.s32.totalorder %s906_s15, %s689_s21  ;;  %p694_p9 = scmp.lt.u32.totalorder %s906_s15, %s960_s7 }
 0x17e   : > { %p695_p10 = scmp.lt.u32.totalorder %s693_s19, %s689_s21  ;;  %p697_p12 = scmp.lt.u32.totalorder %s689_s21, %s906_s15 }
 0x17f   : > { %p691_p7 = pnand %p690_p4, %p822_p5 }
 0x180   : > { %p696_p11 = por %p695_p10, %p694_p9 }
 0x181   : > { %p692_p8 = pneg %p691_p7 }
 0x182   : > { %p698_p13 = por %p697_p12, %p696_p11 }
 0x184   : > { %p699_p0 = pnand %p698_p13, %p692_p8 }
 0x186   : > { %702 = shalt.err (!%p699_p0)
}
 0x187   : > { %s742_s13 = smov 256   ;;  %s743_s14 = smov 16  }
 0x188   : > { %630 = dma.vmem_to_hbm [thread:$0]  (%p822_p5), %s908_s9, 1024, %s906_s15, %s912_s28, %s742_s13, %s742_s13, %s743_s14  }
 0x189 PF: > { %p636_p1 = scmp.ge.s32.totalorder %s737_s27, 2  ;;  %s548_s16 = sand.u32 1, %s725_s24  }
 0x18a   : > { %s549_s17 = scalar_lea.sflag [#allocation3], %s548_s16 }
 0x18b   : > { %p633_p2 = pnand %p636_p1, %p826_p6 }
 0x18d   : > { %720 = dma.done.wait (!%p633_p2), %s549_s17, 1024  }
 0x18e   : > { %722 = vsyncadd (!%p633_p2), %s549_s17, 4294966272  ;;  %p17_p3 = scmp.ge.s32.totalorder %s809_s30, 6   ;;  %s963_s24 = smov %s729_s25 }
 0x18f   : > { %s964_s25 = smov %s733_s26  ;;  %s965_s26 = smov %s820_s10 }
 0x190   : > { %s966_s27 = smov %s809_s30  ;;  %19 = sbr.rel (!%p17_p3) target bundleno = 3 (0x3), region = 86 }
 0x197   :  { %554 = vsyncpa [#allocation3], 1 }
 0x198   :  { %556 = vsyncpa [#allocation3 + $0x1], 1 }

</bundles_post_ra>
